<compile_context>
chip_gen: v6e
topology: v6e:2x2x1
jax: 0.10.0
libtpu: 0.0.40
codegen_flags: <defaults>
</compile_context>

<pallas_src>
import jax
import jax.numpy as jnp
from jax.experimental import pallas as pl
from jax.experimental.pallas import tpu as pltpu

D_IN = 32            # input feature width fed to each sub-model (synthetic choice)
D_SUB = 1000         # each sub-model's output width
D_CAT = 3 * D_SUB    # 3000 = fc input width from the PyTorch module
D_OUT = 4            # fc output width

# Lane-padded widths (multiples of 128) -> full vreg/DMA tiles, unmasked stores.
D_CAT_PAD = 3072     # 24 * 128
D_OUT_PAD = 128


def ensemble_kernel(x_ref, wh_ref, bh_ref, wfc_ref, bfc_ref, out_ref):
    # x: (B_TILE, D_IN) bf16.  Weights are VMEM-resident across the batch grid
    # (constant index_map), so only x / out tiles are DMA'd per grid step.
    x = x_ref[...]

    # Fused heads: cat((x1, x2, x3), dim=1) == x @ [W_A|W_B|W_C] + [b_A|b_B|b_C].
    # bf16 operands, f32 MXU accumulation; bias added in f32.
    cat = jnp.dot(x, wh_ref[...], preferred_element_type=jnp.float32) + bh_ref[...]

    # fc: canonical (K, N) RHS = (3072, 128), so no in-kernel transpose.  Padded
    # rows/cols of W_fc and b_fc are zero -> out[:, 4:] == 0, out[:, :4] exact.
    out = jnp.dot(cat.astype(jnp.bfloat16), wfc_ref[...],
                  preferred_element_type=jnp.float32) + bfc_ref[...]

    out_ref[...] = out.astype(out_ref.dtype)


def ensemble_forward(x, w_heads, b_heads, w_fc, b_fc, *, b_tile=None):
    B = x.shape[0]
    if b_tile is None:
        b_tile = min(B, 128)
    assert B % b_tile == 0, "batch must be divisible by the batch tile"
    grid = (B // b_tile,)

    const = lambda i: (0, 0)  # resident weights: same block every grid step

    out_full = pl.pallas_call(
        ensemble_kernel,
        out_shape=jax.ShapeDtypeStruct((B, D_OUT_PAD), jnp.float32),
        grid_spec=pltpu.PrefetchScalarGridSpec(
            num_scalar_prefetch=0,
            grid=grid,
            in_specs=[
                pl.BlockSpec((b_tile, D_IN), lambda i: (i, 0)),        # x tile (bf16)
                pl.BlockSpec((D_IN, D_CAT_PAD), const),                # W_heads (bf16, resident)
                pl.BlockSpec((1, D_CAT_PAD), const),                   # b_heads (f32, resident)
                pl.BlockSpec((D_CAT_PAD, D_OUT_PAD), const),           # W_fc    (bf16, resident)
                pl.BlockSpec((1, D_OUT_PAD), const),                   # b_fc    (f32, resident)
            ],
            out_specs=pl.BlockSpec((b_tile, D_OUT_PAD), lambda i: (i, 0)),
        ),
        # Weight-DMA-bound at small batch: keep the grid on one TensorCore.
        # TODO(synk): switch to ("parallel",) on v7x once per-TC batch slices are large
        # enough to amortize a duplicated ~1 MiB resident-weight fetch; re-derive b_tile
        # for v7x's 64 MiB VMEM vs v5e/v6e's 128 MiB before raising it past ~1024.
        compiler_params=pltpu.CompilerParams(dimension_semantics=("arbitrary",)),
    )(x.astype(jnp.bfloat16), w_heads, b_heads, w_fc, b_fc)

    return out_full[:, :D_OUT]


def _init_params(key):
    """Per-head params, mirroring the PyTorch module structure (modelA/B/C + fc)."""
    ks = jax.random.split(key, 8)
    scale_sub = 1.0 / jnp.sqrt(D_IN)
    scale_fc = 1.0 / jnp.sqrt(D_CAT)
    wa = jax.random.normal(ks[0], (D_IN, D_SUB), jnp.float32) * scale_sub
    wb = jax.random.normal(ks[1], (D_IN, D_SUB), jnp.float32) * scale_sub
    wc = jax.random.normal(ks[2], (D_IN, D_SUB), jnp.float32) * scale_sub
    ba = jax.random.normal(ks[3], (1, D_SUB), jnp.float32) * scale_sub
    bb = jax.random.normal(ks[4], (1, D_SUB), jnp.float32) * scale_sub
    bc = jax.random.normal(ks[5], (1, D_SUB), jnp.float32) * scale_sub
    wfc = jax.random.normal(ks[6], (D_CAT, D_OUT), jnp.float32) * scale_fc
    bfc = jax.random.normal(ks[7], (1, D_OUT), jnp.float32) * scale_fc
    return wa, wb, wc, ba, bb, bc, wfc, bfc


def _prepare_kernel_params(wa, wb, wc, ba, bb, bc, wfc, bfc):
    """One-time (init-time) repack: fuse heads, pad lanes to x128, cast weights to bf16."""
    pad_cat = D_CAT_PAD - D_CAT
    pad_out = D_OUT_PAD - D_OUT
    w_heads = jnp.concatenate([wa, wb, wc], axis=1)                            # (D_IN, 3000)
    b_heads = jnp.concatenate([ba, bb, bc], axis=1)                            # (1, 3000)
    w_heads = jnp.pad(w_heads, ((0, 0), (0, pad_cat))).astype(jnp.bfloat16)    # (D_IN, 3072)
    b_heads = jnp.pad(b_heads, ((0, 0), (0, pad_cat)))                         # (1, 3072) f32
    w_fc = jnp.pad(wfc, ((0, pad_cat), (0, pad_out))).astype(jnp.bfloat16)     # (3072, 128)
    b_fc = jnp.pad(bfc, ((0, 0), (0, pad_out)))                                # (1, 128) f32
    return w_heads, b_heads, w_fc, b_fc


def _reference(x, wa, wb, wc, ba, bb, bc, wfc, bfc):
    # Pure-JAX f32 reference mirroring the PyTorch forward: three heads, cat, fc.
    x1 = x @ wa + ba
    x2 = x @ wb + bb
    x3 = x @ wc + bc
    cat = jnp.concatenate([x1, x2, x3], axis=1)
    return cat @ wfc + bfc


if __name__ == "__main__":
    key = jax.random.PRNGKey(0)
    kx, kp = jax.random.split(key)

    B = 32            # small batch; b_tile=16 exercises the 2-step batch grid
    x = jax.random.normal(kx, (B, D_IN), jnp.float32)
    params = _init_params(kp)
    kernel_params = _prepare_kernel_params(*params)

    out = ensemble_forward(x, *kernel_params, b_tile=16)
    out = jax.block_until_ready(out)

    ref = _reference(x, *params)
    assert out.shape == (B, D_OUT)
    # bf16 inputs/weights with f32 accumulation: expect ~1e-2 agreement vs the f32 reference.
    assert jnp.allclose(out, ref, atol=5e-2, rtol=5e-2), float(jnp.max(jnp.abs(out - ref)))
    print("KERNEL_OK")
</pallas_src>

<mosaic_0001>
module attributes {stable_mosaic.version = 11 : i64} {
  func.func @ensemble_kernel(%arg0: i32, %arg1: memref<16x32xbf16, #tpu.memory_space<vmem>>, %arg2: memref<32x3072xbf16, #tpu.memory_space<vmem>>, %arg3: memref<1x3072xf32, #tpu.memory_space<vmem>>, %arg4: memref<3072x128xbf16, #tpu.memory_space<vmem>>, %arg5: memref<1x128xf32, #tpu.memory_space<vmem>>, %arg6: memref<16x128xf32, #tpu.memory_space<vmem>>) attributes {dimension_semantics = [#tpu.dimension_semantics<arbitrary>], iteration_bounds = array<i64: 2>, scalar_prefetch = 0 : i64, scratch_operands = 0 : i64, tpu.core_type = #tpu.core_type<tc>, window_params = [{transform_indices = @transform_0, window_bounds = array<i64: 16, 32>}, {pipeline_mode = #tpu.pipeline_mode<synchronous>, transform_indices = @transform_1, window_bounds = array<i64: 32, 3072>}, {pipeline_mode = #tpu.pipeline_mode<synchronous>, transform_indices = @transform_2, window_bounds = array<i64: 1, 3072>}, {pipeline_mode = #tpu.pipeline_mode<synchronous>, transform_indices = @transform_3, window_bounds = array<i64: 3072, 128>}, {pipeline_mode = #tpu.pipeline_mode<synchronous>, transform_indices = @transform_4, window_bounds = array<i64: 1, 128>}, {transform_indices = @transform_5, window_bounds = array<i64: 16, 128>}]} {
    %c0 = arith.constant 0 : index
    %c0_0 = arith.constant 0 : index
    %0 = vector.load %arg1[%c0, %c0_0] : memref<16x32xbf16, #tpu.memory_space<vmem>>, vector<16x32xbf16>
    %c0_1 = arith.constant 0 : index
    %c0_2 = arith.constant 0 : index
    %1 = vector.load %arg2[%c0_1, %c0_2] : memref<32x3072xbf16, #tpu.memory_space<vmem>>, vector<32x3072xbf16>
    %cst = arith.constant dense<0.000000e+00> : vector<16x3072xf32>
    %2 = tpu.matmul %0, %1, %cst {dimension_numbers = #tpu.dot_dimension_numbers<[1], [0], [0], [1], [0, 0, 1, 1], [], []>} : vector<16x32xbf16>, vector<32x3072xbf16>, vector<16x3072xf32> -> vector<16x3072xf32>
    %c0_3 = arith.constant 0 : index
    %c0_4 = arith.constant 0 : index
    %3 = vector.load %arg3[%c0_3, %c0_4] : memref<1x3072xf32, #tpu.memory_space<vmem>>, vector<1x3072xf32>
    %4 = vector.broadcast %3 : vector<1x3072xf32> to vector<16x3072xf32>
    %5 = arith.addf %2, %4 : vector<16x3072xf32>
    %6 = arith.truncf %5 : vector<16x3072xf32> to vector<16x3072xbf16>
    %c0_5 = arith.constant 0 : index
    %c0_6 = arith.constant 0 : index
    %7 = vector.load %arg4[%c0_5, %c0_6] : memref<3072x128xbf16, #tpu.memory_space<vmem>>, vector<3072x128xbf16>
    %cst_7 = arith.constant dense<0.000000e+00> : vector<16x128xf32>
    %8 = tpu.matmul %6, %7, %cst_7 {dimension_numbers = #tpu.dot_dimension_numbers<[1], [0], [0], [1], [0, 0, 1, 1], [], []>} : vector<16x3072xbf16>, vector<3072x128xbf16>, vector<16x128xf32> -> vector<16x128xf32>
    %c0_8 = arith.constant 0 : index
    %c0_9 = arith.constant 0 : index
    %9 = vector.load %arg5[%c0_8, %c0_9] : memref<1x128xf32, #tpu.memory_space<vmem>>, vector<1x128xf32>
    %10 = vector.broadcast %9 : vector<1x128xf32> to vector<16x128xf32>
    %11 = arith.addf %8, %10 : vector<16x128xf32>
    %c0_10 = arith.constant 0 : index
    %c0_11 = arith.constant 0 : index
    %12 = vector.load %arg6[%c0_10, %c0_11] : memref<16x128xf32, #tpu.memory_space<vmem>>, vector<16x128xf32>
    tpu.vector_store %arg6[%c0_10, %c0_11], %11 {strides = array<i32>} : memref<16x128xf32, #tpu.memory_space<vmem>>, vector<16x128xf32>,
    return
  }
  func.func @transform_0(%arg0: i32) -> (i32, i32) {
    %c0_i32 = arith.constant 0 : i32
    %c0_i32_0 = arith.constant 0 : i32
    return %arg0, %c0_i32 : i32, i32
  }
  func.func @transform_1(%arg0: i32) -> (i32, i32) {
    %c0_i32 = arith.constant 0 : i32
    %c0_i32_0 = arith.constant 0 : i32
    %c0_i32_1 = arith.constant 0 : i32
    return %c0_i32, %c0_i32_0 : i32, i32
  }
  func.func @transform_2(%arg0: i32) -> (i32, i32) {
    %c0_i32 = arith.constant 0 : i32
    %c0_i32_0 = arith.constant 0 : i32
    %c0_i32_1 = arith.constant 0 : i32
    return %c0_i32, %c0_i32_0 : i32, i32
  }
  func.func @transform_3(%arg0: i32) -> (i32, i32) {
    %c0_i32 = arith.constant 0 : i32
    %c0_i32_0 = arith.constant 0 : i32
    %c0_i32_1 = arith.constant 0 : i32
    return %c0_i32, %c0_i32_0 : i32, i32
  }
  func.func @transform_4(%arg0: i32) -> (i32, i32) {
    %c0_i32 = arith.constant 0 : i32
    %c0_i32_0 = arith.constant 0 : i32
    %c0_i32_1 = arith.constant 0 : i32
    return %c0_i32, %c0_i32_0 : i32, i32
  }
  func.func @transform_5(%arg0: i32) -> (i32, i32) {
    %c0_i32 = arith.constant 0 : i32
    %c0_i32_0 = arith.constant 0 : i32
    return %arg0, %c0_i32 : i32, i32
  }
}

</mosaic_0001>

<bundles_post_ra>
// kernel: tpu_custom_call.1
= control target key start
LH: loop header
LB: loop body
LE: loop exit
PB: predicated region body
PF: predicated region fallthrough
CT: control target
= control target key end

     0   :  { %10 = vsyncpa [#allocation3], 0  ;;  %s4836_s0 = inlined_call_operand.hbm [shape: bf16[32,32], index: 0, kind: input, shape index: {}]   ;;  %s4837_s1 = inlined_call_operand.hbm [shape: bf16[32,3072], index: 1, kind: input, shape index: {}]   ;;  %s4838_s2 = inlined_call_operand.hbm [shape: f32[1,3072], index: 2, kind: input, shape index: {}]   ;;  %s4839_s3 = inlined_call_operand.hbm [shape: bf16[3072,128], index: 3, kind: input, shape index: {}]   ;;  %s4840_s4 = inlined_call_operand.vmem [shape: f32[1,128], index: 4, kind: input, shape index: {}]   ;;  %s4841_s5 = inlined_call_operand.hbm [shape: f32[32,128], index: 5, kind: output, shape index: {}]  }
   0x1   :  { %12 = vsyncpa [#allocation3 + $0x1], 0 }
   0x2   :  { %13 = vsyncpa [#allocation6], 0 }
   0x3   :  { %14 = vsyncpa [#allocation9], 0 }
   0x4   :  { %15 = vsyncpa [#allocation4], 0 }
   0x5   :  { %17 = vsyncpa [#allocation4 + $0x1], 0  ;;  %s4445_s18 = smov 0   ;;  %s4447_s19 = smov 0  }
   0x6   :  { %s4449_s20 = smov 0   ;;  %s4451_s21 = smov 0  }
   0x7 LB: > { %s4466_s22 = sadd.s32 4294967295, %s4401_s21   ;;  %s3406_s23 = sadd.s32 4294967294, %s4401_s21   ;;  %s4401_s21 = sphi %s4451_s21, %s4867_s21   ;;  %s4397_s20 = sphi %s4449_s20, %s4866_s20   ;;  %s4393_s19 = sphi %s4447_s19, %s4865_s19   ;;  %s4389_s18 = sphi %s4445_s18, %s4864_s18  }
   0x8   : > { %p43_p0 = scmp.ne.s32.totalorder %s4393_s19, %s4389_s18  ;;  %p4842_p1 = scmp.eq.s32.totalorder %s4466_s22, 0 }
   0x9   : > { %p157_p3 = scmp.eq.s32.totalorder %s3406_s23, 1  ;;  %p3407_p5 = scmp.ge.s32.totalorder %s4401_s21, 1 }
   0xa   : > { %p4475_p4 = por %p4842_p1, %p43_p0  ;;  %p164_p7 = scmp.lt.s32.totalorder %s4401_s21, 3 }
   0xb   : > { %p4480_p6 = por %p157_p3, %p43_p0  ;;  %s4403_s27 = smov [#allocation5]  }
   0xc   : > { %s4847_s24 = scalar_select %p4475_p4, 1, 0 }
   0xd   : > { %s4848_s25 = scalar_select %p4480_p6, 1, 0 }
   0xe   : > { %p4485_p8 = pnand %p3407_p5, %p164_p7  ;;  %s176_s28 = sshll.u32 %s4403_s27, 4  ;;  %s177_s28 = int_to_ptr.vmem [resolvable:$true] %s176_s28 }
   0xf   : > { %s4404_s30 = smov [#allocation7]   ;;  %s4405_s7 = smov [#allocation8]  }
  0x10   : > { %s4849_s26 = scalar_select %p4485_p8, 1, 0 }
  0x11   : > { %p3962_p9 = pneg %p4485_p8  ;;  %s190_s6 = sshll.u32 %s4404_s30, 4  ;;  %s191_s6 = int_to_ptr.vmem [resolvable:$true] %s190_s6 }
  0x12   : > { %s200_s8 = sshll.u32 %s4405_s7, 4  ;;  %s4234_s9 = scalar_lea.vmem %s177_s28, 6144  ;;  %s201_s8 = int_to_ptr.vmem [resolvable:$true] %s200_s8 }
  0x13   : > { %p4494_p11 = pnand %p3962_p9, %p4842_p1  ;;  %p4235_p13 = scmp.ne.s32.totalorder %s177_s28, %s4234_s9 }
  0x14   : > { %p4242_p5 = scmp.lt.s32.totalorder %s177_s28, %s177_s28  ;;  %p4243_p7 = scmp.lt.s32.totalorder %s4234_s9, %s4234_s9 }
  0x15   : > { %p4225_p12 = pneg %p4494_p11 }
  0x16   : > { %p4244_p9 = por %p4243_p7, %p4242_p5 }
  0x17   : > { %p4237_p0 = pnand %p4235_p13, %p4225_p12 }
  0x19   : > { %p4238_p3 = pneg %p4237_p0 }
  0x1b   : > { %p4245_p10 = pnand %p4244_p9, %p4238_p3 }
  0x1d   : > { %4248 = shalt.err (!%p4245_p10)
}
  0x1e   : > { %s4406_s10 = smov 1536   ;;  %s4407_s11 = smov 96  }
  0x1f   : > { %3965 = dma.hbm_to_vmem [thread:$0]  (!%p4494_p11), %s4837_s1, 6144, %s177_s28, [#allocation6], %s4406_s10, %s4406_s10, %s4407_s11  }
  0x20   : > { %s4260_s14 = scalar_lea.vmem %s191_s6, 384  ;;  %p4268_p2 = scmp.lt.s32.totalorder %s191_s6, %s191_s6 }
  0x21   : > { %p4261_p1 = scmp.ne.s32.totalorder %s191_s6, %s4260_s14  ;;  %p4269_p6 = scmp.lt.s32.totalorder %s4260_s14, %s4260_s14 }
  0x23   : > { %p4263_p13 = pnand %p4261_p1, %p4225_p12  ;;  %p4270_p5 = por %p4269_p6, %p4268_p2 }
  0x25   : > { %p4264_p0 = pneg %p4263_p13 }
  0x27   : > { %p4271_p3 = pnand %p4270_p5, %p4264_p0 }
  0x29   : > { %4274 = shalt.err (!%p4271_p3)
}
  0x2a   : > { %3968 = dma.hbm_to_vmem [thread:$0]  (!%p4494_p11), %s4838_s2, 384, %s191_s6, [#allocation6]  }
  0x2b   : > { %s4286_s17 = scalar_lea.vmem %s201_s8, 24576  ;;  %p4294_p9 = scmp.lt.s32.totalorder %s201_s8, %s201_s8 }
  0x2c   : > { %p4287_p10 = scmp.ne.s32.totalorder %s201_s8, %s4286_s17  ;;  %p4295_p13 = scmp.lt.s32.totalorder %s4286_s17, %s4286_s17 }
  0x2e   : > { %p4289_p7 = pnand %p4287_p10, %p4225_p12  ;;  %p4296_p4 = por %p4295_p13, %p4294_p9 }
  0x30   : > { %p4290_p1 = pneg %p4289_p7 }
  0x32   : > { %p4297_p2 = pnand %p4296_p4, %p4290_p1 }
  0x34   : > { %4300 = shalt.err (!%p4297_p2)
}
  0x35   : > { %s4844_s23 = smov 64   ;;  %s4409_s27 = smov 4  }
  0x36   : > { %3971 = dma.hbm_to_vmem [thread:$0]  (!%p4494_p11), %s4839_s3, 24576, %s201_s8, [#allocation9], %s4844_s23, %s4844_s23, %s4409_s27  }
  0x37   : > { %s4528_s6 = sadd.s32 1, %s4401_s21   ;;  %s30_s9 = sadd.s32 1, %s4397_s20 }
  0x38   : > { %s27_s7 = ssub.s32 %s4401_s21, %s4528_s6  ;;  %p37_p6 = scmp.ne.s32.totalorder %s4397_s20, %s4393_s19 }
  0x39   : > { %p28_p4 = scmp.eq.s32.totalorder %s27_s7, 0  ;;  %p38_p12 = scmp.eq.s32.totalorder %s4401_s21, 0 }
  0x3a   : > { %p3983_p0 = scmp.lt.s32.totalorder %s4401_s21, 2  ;;  %p4851_p3 = scmp.eq.s32.totalorder %s4466_s22, 1 }
  0x3b   : > { %s4538_s10 = scalar_select %p28_p4, %s4397_s20, %s30_s9  }
  0x3c   : > { %p39_p5 = por %p38_p12, %p37_p6  ;;  %p4542_p10 = por %p4851_p3, %p37_p6 }
  0x3d   : > { %s217_s11 = sand.u32 1, %s4397_s20   ;;  %s3680_s12 = sshll.u32 %s4401_s21, 7 }
  0x3e   : > { %s4852_s29 = scalar_select %p4542_p10, 1, 0 }
  0x3f   : > { %s3412_s8 = sshll.u32 %s217_s11, 3  ;;  %s4551_s15 = scalar_lea.hbm %s4836_s0, %s3680_s12 }
  0x40   : > { %s221_s16 = scalar_lea.vmem [#allocation2], %s3412_s8  ;;  %p4553_p11 = pnand %p3983_p0, %p39_p5 }
  0x41   : > { %s228_s17 = sshll.u32 %s221_s16, 4  ;;  %s4559_s30 = scalar_lea.sflag [#allocation3], %s217_s11  ;;  %s4557_s17 = int_to_ptr.vmem [resolvable:$true] %s228_s17 }
  0x42   : > { %s4301_s7 = scalar_lea.hbm %s4551_s15, 128  ;;  %p4303_p1 = pneg %p4553_p11 }
  0x43   : > { %p4302_p7 = scmp.ne.s32.totalorder %s4551_s15, %s4301_s7  ;;  %s4306_s8 = scalar_lea.hbm %s4836_s0, 256 }
  0x44   : > { %p4307_p2 = scmp.lt.s32.totalorder %s4551_s15, %s4836_s0  ;;  %p4308_p4 = scmp.lt.s32.totalorder %s4306_s8, %s4301_s7 }
  0x45   : > { %p4304_p9 = pnand %p4303_p1, %p4302_p7 }
  0x46   : > { %p4309_p6 = por %p4308_p4, %p4307_p2 }
  0x47   : > { %p4305_p13 = pneg %p4304_p9 }
  0x49   : > { %p4310_p12 = pnand %p4309_p6, %p4305_p13 }
  0x4b   : > { %4313 = shalt.err (!%p4310_p12)
}
  0x4c   : > { %s4314_s11 = scalar_lea.vmem %s4557_s17, 128  ;;  %s4410_s16 = smov [#allocation2]  }
  0x4d   : > { %p4315_p0 = scmp.ne.s32.totalorder %s4557_s17, %s4314_s11  ;;  %s4319_s23 = sshll.u32 %s4410_s16, 4  ;;  %s4320_s23 = int_to_ptr.vmem [resolvable:$false] %s4319_s23 }
  0x4e   : > { %s4321_s9 = scalar_lea.vmem %s4320_s23, 256  ;;  %p4322_p7 = scmp.lt.s32.totalorder %s4557_s17, %s4320_s23 }
  0x4f   : > { %p4317_p5 = pnand %p4315_p0, %p4303_p1  ;;  %p4323_p9 = scmp.lt.s32.totalorder %s4321_s9, %s4314_s11 }
  0x51   : > { %p4318_p3 = pneg %p4317_p5  ;;  %p4324_p10 = por %p4323_p9, %p4322_p7 }
  0x53   : > { %p4325_p8 = pnand %p4324_p10, %p4318_p3 }
  0x55   : > { %4328 = shalt.err (!%p4325_p8)
}
  0x56   : > { %s4854_s7 = smov 64   ;;  %p4855_p1 = scmp.ne.s32.totalorder %s4849_s26, 0 }
  0x57   : > { %3975 = dma.hbm_to_vmem [thread:$0]  (!%p4553_p11), %s4551_s15, 128, %s4557_s17, %s4559_s30, %s4854_s7, %s4854_s7, %s4409_s27  }
  0x58   : > { %240 = sbr.rel (%p4855_p1) target bundleno = 695 (0x2b7), region = 40  ;;  %s4586_s12 = sand.u32 (!%p4855_p1), 1, %s4393_s19  }
  0x59   : > { %s3416_s23 = sshll.u32 (!%p4855_p1), %s4586_s12, 3  ;;  %s243_s8 = scalar_lea.sflag (!%p4855_p1), [#allocation3], %s4586_s12 }
  0x5a   : > { %s4590_s13 = scalar_lea.vmem (!%p4855_p1), [#allocation2], %s3416_s23  ;;  %p4856_p8 = scmp.ne.s32.totalorder (!%p4855_p1), %s4847_s24, 0 }
  0x5d   : > { %4372 = dma.done.wait (%p4856_p8), %s243_s8, 128  }
  0x5e   : > { %4374 = vsyncadd (%p4856_p8), %s243_s8, 4294967168  ;;  %p4857_p10 = scmp.eq.s32.totalorder %s4466_s22, 0 }
  0x60   : > { %4376 = dma.done.wait (%p4857_p10), [#allocation6], 6528   ;;  %p4858_p11 = pmov %p4857_p10 }
  0x61   : > { %p4859_p13 = pmov %p4857_p10 }
  0x62   : > { %4378 = vsyncadd (%p4858_p11), [#allocation6], 4294960768 }
  0x63   : > { %4380 = dma.done.wait (%p4859_p13), [#allocation9], 24576   ;;  %p4860_p2 = pmov %p4857_p10 }
  0x64   : > { %v4411_v0 = vmov 0   ;;  %v314_v1 = vld [vmem:[#allocation5 + $0xc0] sm:$0xff]  ;;  %v315_v3 = vld [vmem:[#allocation5 + $0xc8] sm:$0xff]  ;;  %v316_v15 = vld [vmem:[#allocation5 + $0xd0] sm:$0xff]  ;;  %vm709_vm0 = vcmask 261120   ;;  %s3420_s27 = sshll.u32 %s4586_s12, 4 }
  0x65   : > { %4382 = vsyncadd (%p4860_p2), [#allocation9], 4294942720  ;;  %745 = vmatprep.mubr.bf16.mxu0 %v4411_v0  ;;  %788 = vmatprep.mubr.bf16.mxu1 %v4411_v0  ;;  %v326_v2 = vld [vmem:[#allocation5 + $0x120] sm:$0xff]  ;;  %v327_v5 = vld [vmem:[#allocation5 + $0x128] sm:$0xff]  ;;  %s284_s15 = scalar_lea.vmem [#allocation10], %s3420_s27  ;;  %s3681_s28 = sshll.u32 %s4466_s22, 8 }
  0x66   : > { %v3447_v4 = vcombine.high %v314_v1, %v326_v2  ;;  %v3446_v6 = vcombine.low %v314_v1, %v326_v2  ;;  %v290_v7 = vld [vmem:[#allocation5] sm:$0xff]  ;;  %v3449_v9 = vcombine.high %v315_v3, %v327_v5  ;;  %v3448_v10 = vcombine.low %v315_v3, %v327_v5  ;;  %v291_v12 = vld [vmem:[#allocation5 + $0x8] sm:$0xff]  ;;  %v328_v17 = vld [vmem:[#allocation5 + $0x130] sm:$0xff]  ;;  %s3304_s17 = sshll.u32 %s284_s15, 4  ;;  %s4793_s11 = scalar_lea.hbm %s4841_s5, %s3681_s28  ;;  %s4788_s17 = int_to_ptr.vmem [resolvable:$true] %s3304_s17 }
  0x67   : > { %v302_v8 = vld [vmem:[#allocation5 + $0x60] sm:$0xff]  ;;  %v303_v13 = vld [vmem:[#allocation5 + $0x68] sm:$0xff]  ;;  %v317_v18 = vld [vmem:[#allocation5 + $0xd8] sm:$0xff]  ;;  %v3451_v21 = vcombine.high %v316_v15, %v328_v17  ;;  %v3450_v28 = vcombine.low %v316_v15, %v328_v17  ;;  %s3291_s16 = scalar_lea.sflag [#allocation4], %s4586_s12  ;;  %s4329_s9 = scalar_lea.vmem %s4788_s17, 256 }
  0x68   : > { %v3423_v11 = vcombine.high %v290_v7, %v302_v8  ;;  %725 = vmatprep.subr.bf16.mxu0 %v3447_v4  ;;  %v3425_v14 = vcombine.high %v291_v12, %v303_v13  ;;  %768 = vmatprep.subr.bf16.mxu1 %v3449_v9  ;;  %v3422_v16 = vcombine.low %v290_v7, %v302_v8  ;;  %v329_v19 = vld [vmem:[#allocation5 + $0x138] sm:$0xff]  ;;  %v292_v23 = vld [vmem:[#allocation5 + $0x10] sm:$0xff]  ;;  %v318_v32 = vld [vmem:[#allocation5 + $0xe0] sm:$0xff]  ;;  %p4330_p4 = scmp.ne.s32.totalorder %s4788_s17, %s4329_s9  ;;  %p4861_p6 = scmp.ne.s32.totalorder %s4852_s29, 0 }
  0x69   : > { %726 = vmatpush1.bf16.msra.mxu0 %v3446_v6  ;;  %769 = vmatpush1.bf16.msra.mxu1 %v3448_v10  ;;  %v3424_v20 = vcombine.low %v291_v12, %v303_v13  ;;  %v3453_v22 = vcombine.high %v317_v18, %v329_v19  ;;  %v304_v24 = vld [vmem:[#allocation5 + $0x70] sm:$0xff]  ;;  %v293_v26 = vld [vmem:[#allocation5 + $0x18] sm:$0xff]  ;;  %v3452_v29 = vcombine.low %v317_v18, %v329_v19  ;;  %v330_v33 = vld [vmem:[#allocation5 + $0x140] sm:$0xff]  ;;  %s4412_s22 = smov [#allocation10]  }
  0x6a   : > { %727 = vmatprep.subr.bf16.mxu0 %v3423_v11  ;;  %770 = vmatprep.subr.bf16.mxu1 %v3425_v14  ;;  %v4607_v25 = vld [vmem:[%s4590_s13] sm:$0xff]   ;;  %v3427_v30 = vcombine.high %v292_v23, %v304_v24  ;;  %v319_v34 = vld [vmem:[#allocation5 + $0xe8] sm:$0xff]  ;;  %v3426_v36 = vcombine.low %v292_v23, %v304_v24  ;;  %v3455_v38 = vcombine.high %v318_v32, %v330_v33  ;;  %v294_v40 = vld [vmem:[#allocation5 + $0x20] sm:$0xff]  ;;  %p4331_p12 = pnand %p4330_p4, %p4861_p6  ;;  %s4333_s7 = sshll.u32 %s4412_s22, 4  ;;  %s4334_s7 = int_to_ptr.vmem [resolvable:$false] %s4333_s7 }
  0x6b   : > { %v305_v27 = vld [vmem:[#allocation5 + $0x78] sm:$0xff]  ;;  %v331_v35 = vld [vmem:[#allocation5 + $0x148] sm:$0xff]  ;;  %v306_v41 = vld [vmem:[#allocation5 + $0x80] sm:$0xff]  ;;  %v3454_v44 = vcombine.low %v318_v32, %v330_v33  ;;  %s4335_s23 = scalar_lea.vmem %s4334_s7, 512  ;;  %p4336_p5 = scmp.lt.s32.totalorder %s4788_s17, %s4334_s7 }
  0x6c   : > { %v3429_v31 = vcombine.high %v293_v26, %v305_v27  ;;  %v3428_v37 = vcombine.low %v293_v26, %v305_v27  ;;  %v3457_v39 = vcombine.high %v319_v34, %v331_v35  ;;  %v295_v42 = vld [vmem:[#allocation5 + $0x28] sm:$0xff]  ;;  %v320_v45 = vld [vmem:[#allocation5 + $0xf0] sm:$0xff]  ;;  %v3456_v46 = vcombine.low %v319_v34, %v331_v35  ;;  %v321_v50 = vld [vmem:[#allocation5 + $0xf8] sm:$0xff]  ;;  %p4332_p0 = pneg %p4331_p12  ;;  %p4337_p3 = scmp.lt.s32.totalorder %s4335_s23, %s4329_s9 }
  0x6d   : > { %728 = vmatpush1.bf16.msra.mxu0 %v3422_v16  ;;  %771 = vmatpush1.bf16.msra.mxu1 %v3424_v20  ;;  %v307_v43 = vld [vmem:[#allocation5 + $0x88] sm:$0xff]  ;;  %v3431_v47 = vcombine.high %v294_v40, %v306_v41  ;;  %v332_v48 = vld [vmem:[#allocation5 + $0x150] sm:$0xff]  ;;  %v333_v51 = vld [vmem:[#allocation5 + $0x158] sm:$0xff]  ;;  %v3430_v52 = vcombine.low %v294_v40, %v306_v41 }
  0x6e   : > { %811 = vmatprep.subr.bf16.mxu0 %v3451_v21  ;;  %854 = vmatprep.subr.bf16.mxu1 %v3453_v22  ;;  %v3433_v49 = vcombine.high %v295_v42, %v307_v43  ;;  %v296_v53 = vld [vmem:[#allocation5 + $0x30] sm:$0xff]  ;;  %v3432_v54 = vcombine.low %v295_v42, %v307_v43  ;;  %v3459_v55 = vcombine.high %v320_v45, %v332_v48  ;;  %v297_v58 = vld [vmem:[#allocation5 + $0x38] sm:$0xff]  ;;  %v322_v61 = vld [vmem:[#allocation5 + $0x100] sm:$0xff]  ;;  %p4338_p7 = por %p4337_p3, %p4336_p5 }
  0x6f   : > { %v308_v56 = vld [vmem:[#allocation5 + $0x90] sm:$0xff]  ;;  %v3461_v57 = vcombine.high %v321_v50, %v333_v51  ;;  %v309_v59 = vld [vmem:[#allocation5 + $0x98] sm:$0xff]  ;;  %v3458_v60 = vcombine.low %v320_v45, %v332_v48  ;;  %v3460_v62 = vcombine.low %v321_v50, %v333_v51  ;;  %v334_v1 = vld [vmem:[#allocation5 + $0x160] sm:$0xff] }
  0x70   : > { %3470 = vmatmul.mubr.msk.bf16.vlgmr.msra.gmra.mxu0 %vm709_vm0, %v4607_v25  ;;  %3471 = vmatmul.mubr.msk.bf16.vlgmr.msra.gmra.mxu1 %vm709_vm0, %v4607_v25  ;;  %v3435_v63 = vcombine.high %v296_v53, %v308_v56  ;;  %v3437_v2 = vcombine.high %v297_v58, %v309_v59  ;;  %v323_v3 = vld [vmem:[#allocation5 + $0x108] sm:$0xff]  ;;  %v3434_v5 = vcombine.low %v296_v53, %v308_v56  ;;  %v298_v6 = vld [vmem:[#allocation5 + $0x40] sm:$0xff]  ;;  %v324_v14 = vld [vmem:[#allocation5 + $0x110] sm:$0xff]  ;;  %p4339_p9 = pnand %p4338_p7, %p4332_p0 }
  0x71   : > { %812 = vmatpush1.bf16.msra.mxu0 %v3450_v28  ;;  %855 = vmatpush1.bf16.msra.mxu1 %v3452_v29  ;;  %v335_v4 = vld [vmem:[#allocation5 + $0x168] sm:$0xff]  ;;  %v3436_v7 = vcombine.low %v297_v58, %v309_v59  ;;  %v3463_v8 = vcombine.high %v322_v61, %v334_v1  ;;  %v310_v9 = vld [vmem:[#allocation5 + $0xa0] sm:$0xff]  ;;  %v3462_v13 = vcombine.low %v322_v61, %v334_v1  ;;  %v336_v17 = vld [vmem:[#allocation5 + $0x170] sm:$0xff] }
  0x72   : > { %813 = vmatprep.subr.bf16.mxu0 %v3427_v30  ;;  %856 = vmatprep.subr.bf16.mxu1 %v3429_v31  ;;  %v3465_v10 = vcombine.high %v323_v3, %v335_v4  ;;  %v299_v11 = vld [vmem:[#allocation5 + $0x48] sm:$0xff]  ;;  %v3464_v15 = vcombine.low %v323_v3, %v335_v4  ;;  %v3439_v16 = vcombine.high %v298_v6, %v310_v9  ;;  %v325_v19 = vld [vmem:[#allocation5 + $0x118] sm:$0xff]  ;;  %v300_v22 = vld [vmem:[#allocation5 + $0x50] sm:$0xff] }
  0x73   : > { %831 = vmatprep.mubr.bf16.mxu0 %v4411_v0  ;;  %874 = vmatprep.mubr.bf16.mxu1 %v4411_v0  ;;  %v311_v12 = vld [vmem:[#allocation5 + $0xa8] sm:$0xff]  ;;  %v337_v20 = vld [vmem:[#allocation5 + $0x178] sm:$0xff]  ;;  %v3438_v21 = vcombine.low %v298_v6, %v310_v9  ;;  %v3467_v24 = vcombine.high %v324_v14, %v336_v17  ;;  %v312_v26 = vld [vmem:[#allocation5 + $0xb0] sm:$0xff]  ;;  %v3466_v30 = vcombine.low %v324_v14, %v336_v17 }
  0x74   : > { %v3441_v18 = vcombine.high %v299_v11, %v311_v12  ;;  %v3440_v23 = vcombine.low %v299_v11, %v311_v12  ;;  %v3469_v27 = vcombine.high %v325_v19, %v337_v20  ;;  %v301_v28 = vld [vmem:[#allocation5 + $0x58] sm:$0xff]  ;;  %v3468_v31 = vcombine.low %v325_v19, %v337_v20  ;;  %v4031_v34 = vld [vmem:[#allocation8 + $0x78] sm:$0xff]   ;;  %v4035_v40 = vld [vmem:[#allocation8 + $0x70] sm:$0xff]  }
  0x75   : > { %814 = vmatpush1.bf16.msra.mxu0 %v3426_v36  ;;  %857 = vmatpush1.bf16.msra.mxu1 %v3428_v37  ;;  %v313_v29 = vld [vmem:[#allocation5 + $0xb8] sm:$0xff]  ;;  %v3443_v32 = vcombine.high %v300_v22, %v312_v26  ;;  %v3442_v35 = vcombine.low %v300_v22, %v312_v26  ;;  %v4032_v36 = vld [vmem:[#allocation8 + $0xf8] sm:$0xff]   ;;  %v4036_v41 = vld [vmem:[#allocation8 + $0xf0] sm:$0xff]  }
  0x76   : > { %897 = vmatprep.subr.bf16.mxu0 %v3455_v38  ;;  %940 = vmatprep.subr.bf16.mxu1 %v3457_v39  ;;  %v3445_v33 = vcombine.high %v301_v28, %v313_v29  ;;  %v3444_v37 = vcombine.low %v301_v28, %v313_v29  ;;  %v4033_v38 = vld [vmem:[#allocation8 + $0x38] sm:$0xff]   ;;  %v4037_v42 = vld [vmem:[#allocation8 + $0x30] sm:$0xff]   ;;  %v4040_v45 = vld [vmem:[#allocation8 + $0xe8] sm:$0xff]  }
  0x77   : > { %v4034_v39 = vld [vmem:[#allocation8 + $0xb8] sm:$0xff]   ;;  %v4038_v43 = vld [vmem:[#allocation8 + $0xb0] sm:$0xff]   ;;  %v4044_v48 = vld [vmem:[#allocation8 + $0xe0] sm:$0xff]  }
  0x78   : > { %3472 = vmatmul.mubr.msk.bf16.vlgmr.msra.gmra.mxu0 %vm709_vm0, %v4607_v25  ;;  %3473 = vmatmul.mubr.msk.bf16.vlgmr.msra.gmra.mxu1 %vm709_vm0, %v4607_v25  ;;  %v4046_v50 = vld [vmem:[#allocation8 + $0xa0] sm:$0xff]   ;;  %v4047_v51 = vld [vmem:[#allocation8 + $0x58] sm:$0xff]   ;;  %v4053_v56 = vld [vmem:[#allocation8 + $0x10] sm:$0xff]  }
  0x79   : > { %898 = vmatpush1.bf16.msra.mxu0 %v3454_v44  ;;  %941 = vmatpush1.bf16.msra.mxu1 %v3456_v46  ;;  %v4039_v44 = vld [vmem:[#allocation8 + $0x68] sm:$0xff]   ;;  %v4050_v53 = vld [vmem:[#allocation8 + $0x98] sm:$0xff]   ;;  %v4061_v1 = vld [vmem:[#allocation8] sm:$0xff]  }
  0x7a   : > { %899 = vmatprep.subr.bf16.mxu0 %v3431_v47  ;;  %942 = vmatprep.subr.bf16.mxu1 %v3433_v49  ;;  %v4042_v46 = vld [vmem:[#allocation8 + $0xa8] sm:$0xff]   ;;  %v4043_v47 = vld [vmem:[#allocation8 + $0x60] sm:$0xff]   ;;  %v4063_v3 = vld [vmem:[#allocation8 + $0x178] sm:$0xff]  }
  0x7b   : > { %917 = vmatprep.mubr.bf16.mxu0 %v4411_v0  ;;  %960 = vmatprep.mubr.bf16.mxu1 %v4411_v0  ;;  %v4045_v49 = vld [vmem:[#allocation8 + $0x20] sm:$0xff]   ;;  %v4055_v58 = vld [vmem:[#allocation8 + $0x48] sm:$0xff]   ;;  %v4064_v4 = vld [vmem:[#allocation8 + $0x1f8] sm:$0xff]  }
  0x7c   : > { %v4056_v59 = vld [vmem:[#allocation8 + $0xc8] sm:$0xff]  }
  0x7d   : > { %900 = vmatpush1.bf16.msra.mxu0 %v3430_v52  ;;  %943 = vmatpush1.bf16.msra.mxu1 %v3432_v54  ;;  %v4048_v52 = vld [vmem:[#allocation8 + $0xd8] sm:$0xff]   ;;  %v4051_v54 = vld [vmem:[#allocation8 + $0x50] sm:$0xff]   ;;  %v4058_v61 = vld [vmem:[#allocation8 + $0x88] sm:$0xff]  }
  0x7e   : > { %983 = vmatprep.subr.bf16.mxu0 %v3459_v55  ;;  %1026 = vmatprep.subr.bf16.mxu1 %v3461_v57  ;;  %v4052_v55 = vld [vmem:[#allocation8 + $0xd0] sm:$0xff]   ;;  %v4654_v11 = vld [vmem:[#allocation7] sm:$0xff] }
  0x7f   : > { %v4054_v57 = vld [vmem:[#allocation8 + $0x90] sm:$0xff]  }
  0x80   : > { %3474 = vmatmul.mubr.msk.bf16.vlgmr.msra.gmra.mxu0 %vm709_vm0, %v4607_v25  ;;  %3475 = vmatmul.mubr.msk.bf16.vlgmr.msra.gmra.mxu1 %vm709_vm0, %v4607_v25 }
  0x81   : > { %984 = vmatpush1.bf16.msra.mxu0 %v3458_v60  ;;  %1027 = vmatpush1.bf16.msra.mxu1 %v3460_v62  ;;  %v4057_v60 = vld [vmem:[#allocation8 + $0x8] sm:$0xff]   ;;  %v4059_v62 = vld [vmem:[#allocation8 + $0x40] sm:$0xff]  }
  0x82   : > { %985 = vmatprep.subr.bf16.mxu0 %v3435_v63  ;;  %1028 = vmatprep.subr.bf16.mxu1 %v3437_v2  ;;  %v4060_v63 = vld [vmem:[#allocation8 + $0xc0] sm:$0xff]  }
  0x83   : > { %1003 = vmatprep.mubr.bf16.mxu0 %v4411_v0  ;;  %1046 = vmatprep.mubr.bf16.mxu1 %v4411_v0  ;;  %v4062_v2 = vld [vmem:[#allocation8 + $0x80] sm:$0xff]  }
  0x85   : > { %986 = vmatpush1.bf16.msra.mxu0 %v3434_v5  ;;  %1029 = vmatpush1.bf16.msra.mxu1 %v3436_v7  ;;  %v344_v5 = vlaneseq }
  0x86   : > { %1069 = vmatprep.subr.bf16.mxu0 %v3463_v8  ;;  %1112 = vmatprep.subr.bf16.mxu1 %v3465_v10 }
  0x87   : > { %v4643_v6 = vshrl.u32 %v344_v5, 7  ;;  %v4080_v5 = vld [vmem:[#allocation8 + $0x1d8] sm:$0xff]  }
  0x88   : > { %3476 = vmatmul.mubr.msk.bf16.vlgmr.msra.gmra.mxu0 %vm709_vm0, %v4607_v25  ;;  %3477 = vmatmul.mubr.msk.bf16.vlgmr.msra.gmra.mxu1 %vm709_vm0, %v4607_v25 }
  0x89   : > { %1070 = vmatpush1.bf16.msra.mxu0 %v3462_v13  ;;  %1113 = vmatpush1.bf16.msra.mxu1 %v3464_v15  ;;  %v4646_v7 = vsub.s32 1, %v4643_v6  ;;  %v4649_v8 = vsub.s32 0, %v4643_v6  ;;  %v4652_v10 = vsub.s32 3, %v4643_v6  ;;  %v4657_v12 = vsub.s32 2, %v4643_v6 }
  0x8a   : > { %1071 = vmatprep.subr.bf16.mxu0 %v3439_v16  ;;  %1114 = vmatprep.subr.bf16.mxu1 %v3441_v18  ;;  %v4668_v22 = vsub.s32 5, %v4643_v6  ;;  %v4671_v26 = vsub.s32 7, %v4643_v6 }
  0x8b   : > { %1089 = vmatprep.mubr.bf16.mxu0 %v4411_v0  ;;  %1132 = vmatprep.mubr.bf16.mxu1 %v4411_v0  ;;  %v351_v15 = vrot.slane %v4654_v11, %v4646_v7  ;;  %v347_v17 = vrot.slane %v4654_v11, %v4649_v8  ;;  %v359_v18 = vrot.slane %v4654_v11, %v4652_v10 }
  0x8c   : > { %v355_v20 = vrot.slane %v4654_v11, %v4657_v12 }
  0x8d   : > { %1072 = vmatpush1.bf16.msra.mxu0 %v3438_v21  ;;  %1115 = vmatpush1.bf16.msra.mxu1 %v3440_v23 }
  0x8e   : > { %1155 = vmatprep.subr.bf16.mxu0 %v3467_v24  ;;  %1198 = vmatprep.subr.bf16.mxu1 %v3469_v27 }
  0x90   : > { %3478 = vmatmul.mubr.msk.bf16.vlgmr.msra.gmra.mxu0 %vm709_vm0, %v4607_v25  ;;  %3479 = vmatmul.mubr.msk.bf16.vlgmr.msra.gmra.mxu1 %vm709_vm0, %v4607_v25 }
  0x91   : > { %1156 = vmatpush1.bf16.msra.mxu0 %v3466_v30  ;;  %1199 = vmatpush1.bf16.msra.mxu1 %v3468_v31 }
  0x92   : > { %1157 = vmatprep.subr.bf16.mxu0 %v3443_v32  ;;  %1200 = vmatprep.subr.bf16.mxu1 %v3445_v33 }
  0x93   : > { %1175 = vmatprep.mubr.bf16.mxu0 %v4411_v0  ;;  %1218 = vmatprep.mubr.bf16.mxu1 %v4411_v0  ;;  %v4041_v0 = vld [vmem:[#allocation8 + $0x28] sm:$0xff]  }
  0x95   : > { %1158 = vmatpush1.bf16.msra.mxu0 %v3442_v35  ;;  %1201 = vmatpush1.bf16.msra.mxu1 %v3444_v37  ;;  %v4065_v37 = vld [vmem:[#allocation8 + $0x138] sm:$0xff]  }
  0x96   : > { %3682 = vmatprep.subr.bf16.mxu0 %v4031_v34  ;;  %3704 = vmatprep.subr.bf16.mxu1 %v4032_v36 }
  0x98   : > { %3480 = vmatmul.mubr.msk.bf16.vlgmr.msra.gmra.mxu0 %vm709_vm0, %v4607_v25  ;;  %3481 = vmatmul.mubr.msk.bf16.vlgmr.msra.gmra.mxu1 %vm709_vm0, %v4607_v25  ;;  %v4049_v25 = vld [vmem:[#allocation8 + $0x18] sm:$0xff]  }
  0x99   : > { %3683 = vmatpush3.bf16.msra.mxu0 %v4033_v38  ;;  %3705 = vmatpush3.bf16.msra.mxu1 %v4034_v39  ;;  %v367_v38 = vrot.slane %v4654_v11, %v4668_v22 }
  0x9a   : > { %3684 = vmatprep.subr.bf16.mxu0 %v4035_v40  ;;  %3706 = vmatprep.subr.bf16.mxu1 %v4036_v41 }
  0x9d   : > { %3685 = vmatpush3.bf16.msra.mxu0 %v4037_v42  ;;  %3707 = vmatpush3.bf16.msra.mxu1 %v4038_v43  ;;  %v4066_v42 = vld [vmem:[#allocation8 + $0x1b8] sm:$0xff]   ;;  %v4067_v43 = vld [vmem:[#allocation8 + $0x170] sm:$0xff]  }
  0x9e   : > { %3686 = vmatprep.subr.bf16.mxu0 %v4039_v44  ;;  %3708 = vmatprep.subr.bf16.mxu1 %v4040_v45  ;;  %v375_v45 = vrot.slane %v4654_v11, %v4671_v26 }
  0xa1   : > { %3687 = vmatpush3.bf16.msra.mxu0 %v4041_v0  ;;  %3709 = vmatpush3.bf16.msra.mxu1 %v4042_v46  ;;  %v4068_v46 = vld [vmem:[#allocation8 + $0x1f0] sm:$0xff]  }
  0xa2   : > { %3688 = vmatprep.subr.bf16.mxu0 %v4043_v47  ;;  %3710 = vmatprep.subr.bf16.mxu1 %v4044_v48 }
  0xa5   : > { %3689 = vmatpush3.bf16.msra.mxu0 %v4045_v49  ;;  %3711 = vmatpush3.bf16.msra.mxu1 %v4046_v50  ;;  %v4069_v49 = vld [vmem:[#allocation8 + $0x130] sm:$0xff]  }
  0xa6   : > { %3690 = vmatprep.subr.bf16.mxu0 %v4047_v51  ;;  %3712 = vmatprep.subr.bf16.mxu1 %v4048_v52  ;;  %v4070_v52 = vld [vmem:[#allocation8 + $0x1b0] sm:$0xff]  }
  0xa9   : > { %3691 = vmatpush3.bf16.msra.mxu0 %v4049_v25  ;;  %3713 = vmatpush3.bf16.msra.mxu1 %v4050_v53  ;;  %v4071_v25 = vld [vmem:[#allocation8 + $0x168] sm:$0xff]  }
  0xaa   : > { %3692 = vmatprep.subr.bf16.mxu0 %v4051_v54  ;;  %3714 = vmatprep.subr.bf16.mxu1 %v4052_v55  ;;  %v4072_v55 = vld [vmem:[#allocation8 + $0x1e8] sm:$0xff]  }
  0xad   : > { %3693 = vmatpush3.bf16.msra.mxu0 %v4053_v56  ;;  %3715 = vmatpush3.bf16.msra.mxu1 %v4054_v57 }
  0xae   : > { %3694 = vmatprep.subr.bf16.mxu0 %v4055_v58  ;;  %3716 = vmatprep.subr.bf16.mxu1 %v4056_v59  ;;  %v4073_v59 = vld [vmem:[#allocation8 + $0x128] sm:$0xff]  }
  0xb1   : > { %3695 = vmatpush3.bf16.msra.mxu0 %v4057_v60  ;;  %3717 = vmatpush3.bf16.msra.mxu1 %v4058_v61  ;;  %v4074_v61 = vld [vmem:[#allocation8 + $0x1a8] sm:$0xff]  }
  0xb2   : > { %3696 = vmatprep.subr.bf16.mxu0 %v4059_v62  ;;  %3718 = vmatprep.subr.bf16.mxu1 %v4060_v63  ;;  %v4075_v62 = vld [vmem:[#allocation8 + $0x160] sm:$0xff]  }
  0xb5   : > { %3697 = vmatpush3.bf16.msra.mxu0 %v4061_v1  ;;  %3719 = vmatpush3.bf16.msra.mxu1 %v4062_v2  ;;  %v4076_v1 = vld [vmem:[#allocation8 + $0x1e0] sm:$0xff]  }
  0xb6   : > { %3726 = vmatprep.subr.bf16.mxu0 %v4063_v3  ;;  %3748 = vmatprep.subr.bf16.mxu1 %v4064_v4  ;;  %v4077_v2 = vld [vmem:[#allocation8 + $0x120] sm:$0xff]   ;;  %v4079_v4 = vld [vmem:[#allocation8 + $0x158] sm:$0xff]  }
  0xb7   : > { %v4078_v3 = vld [vmem:[#allocation8 + $0x1a0] sm:$0xff]  }
 0x130   : > { %v747_v9 = vpop.f32.mrf.mxu0  ;;  %v790_v13 = vpop.f32.mrf.mxu1 }
 0x131   : > { %v748_v31 = vadd.f32 %v747_v9, %v347_v17  ;;  %v791_v35 = vadd.f32 %v790_v13, %v355_v20  ;;  %v4081_v13 = vld [vmem:[#allocation8 + $0x118] sm:$0xff]  }
 0x132   : > { %v749_v14 = vpop.f32.mrf.mxu0  ;;  %v792_v16 = vpop.f32.mrf.mxu1 }
 0x133   : > { %v750_v27 = vadd.f32 %v749_v14, %v351_v15  ;;  %v793_v32 = vadd.f32 %v792_v16, %v359_v18  ;;  %v4083_v16 = vld [vmem:[#allocation8 + $0x150] sm:$0xff]  }
 0x134   : > { %v751_v19 = vpop.f32.mrf.mxu0  ;;  %v794_v21 = vpop.f32.mrf.mxu1 }
 0x135   : > { %v752_v23 = vadd.f32 %v751_v19, %v347_v17  ;;  %v795_v28 = vadd.f32 %v794_v21, %v355_v20  ;;  %v4084_v17 = vld [vmem:[#allocation8 + $0x1d0] sm:$0xff]   ;;  %v4690_v21 = vsub.s32 4, %v4643_v6 }
 0x136   : > { %v753_v24 = vpop.f32.mrf.mxu0  ;;  %v796_v30 = vpop.f32.mrf.mxu1  ;;  %v4085_v19 = vld [vmem:[#allocation8 + $0x110] sm:$0xff]  }
 0x137   : > { %v754_v29 = vadd.f32 %v753_v24, %v351_v15  ;;  %v797_v33 = vadd.f32 %v796_v30, %v359_v18  ;;  %v1229_v40 = vpack.c.bf16 %v752_v23, %v748_v31  ;;  %v1231_v0 = vpack.c.bf16 %v795_v28, %v791_v35  ;;  %v4082_v15 = vld [vmem:[#allocation8 + $0x198] sm:$0xff]   ;;  %v4086_v23 = vld [vmem:[#allocation8 + $0x190] sm:$0xff]   ;;  %v4087_v24 = vld [vmem:[#allocation8 + $0x148] sm:$0xff]  }
 0x138   : > { %v4673_v34 = vpop.f32.mrf.mxu0  ;;  %v4677_v39 = vpop.f32.mrf.mxu1  ;;  %v4088_v28 = vld [vmem:[#allocation8 + $0x1c8] sm:$0xff]  }
 0x139   : > { %v1230_v36 = vpack.c.bf16 %v754_v29, %v750_v27  ;;  %v1232_v41 = vpack.c.bf16 %v797_v33, %v793_v32  ;;  %v4693_v27 = vsub.s32 6, %v4643_v6  ;;  %v4695_v29 = vld [vmem:[#allocation7 + $0x8] sm:$0xff]  ;;  %v4089_v31 = vld [vmem:[#allocation8 + $0x108] sm:$0xff]   ;;  %v363_v33 = vrot.slane %v4654_v11, %v4690_v21 }
 0x13a   : > { %v835_v44 = vpop.f32.mrf.mxu0  ;;  %v878_v47 = vpop.f32.mrf.mxu1  ;;  %v4090_v35 = vld [vmem:[#allocation8 + $0x188] sm:$0xff]  }
 0x13b   : > { %2828 = vmatprep.mubr.bf16.mxu0 %v1230_v36  ;;  %2869 = vmatprep.mubr.bf16.mxu1 %v1232_v41  ;;  %v836_v50 = vadd.f32 %v835_v44, %v367_v38  ;;  %v879_v53 = vadd.f32 %v878_v47, %v375_v45  ;;  %v4091_v36 = vld [vmem:[#allocation8 + $0x140] sm:$0xff]   ;;  %v371_v6 = vrot.slane %v4654_v11, %v4693_v27  ;;  %v4095_v11 = vld [vmem:[#allocation8 + $0x278] sm:$0xff]  }
 0x13c   : > { %2829 = vmatmul.mubr.bf16.vlgmr.msra.gmra.mxu0 %v1229_v40  ;;  %v4681_v48 = vpop.f32.mrf.mxu0  ;;  %2870 = vmatmul.mubr.bf16.vlgmr.msra.gmra.mxu1 %v1231_v0  ;;  %v4683_v51 = vpop.f32.mrf.mxu1  ;;  %v391_v40 = vrot.slane %v4695_v29, %v4652_v10  ;;  %v834_v44 = vadd.f32 %v4673_v34, %v363_v33  ;;  %v4094_v0 = vld [vmem:[#allocation8 + $0x180] sm:$0xff]   ;;  %v4098_v34 = vld [vmem:[#allocation8 + $0x2b8] sm:$0xff]  }
 0x13d   : > { %3727 = vmatpush3.bf16.msra.mxu0 %v4065_v37  ;;  %3749 = vmatpush3.bf16.msra.mxu1 %v4066_v42  ;;  %v4092_v37 = vld [vmem:[#allocation8 + $0x1c0] sm:$0xff]   ;;  %v881_v47 = vadd.f32 %v4683_v51, %v371_v6  ;;  %v4101_v51 = vld [vmem:[#allocation8 + $0x230] sm:$0xff]  }
 0x13e   : > { %3728 = vmatprep.subr.bf16.mxu0 %v4067_v43  ;;  %v839_v54 = vpop.f32.mrf.mxu0  ;;  %3750 = vmatprep.subr.bf16.mxu1 %v4068_v46  ;;  %v882_v57 = vpop.f32.mrf.mxu1  ;;  %v4093_v42 = vld [vmem:[#allocation8 + $0x100] sm:$0xff]   ;;  %v877_v46 = vadd.f32 %v4677_v39, %v371_v6  ;;  %v4121_v6 = vld [vmem:[#allocation8 + $0x208] sm:$0xff]  }
 0x13f   : > { %v840_v56 = vadd.f32 %v839_v54, %v367_v38  ;;  %v883_v58 = vadd.f32 %v882_v57, %v375_v45  ;;  %v383_v38 = vrot.slane %v4695_v29, %v4646_v7  ;;  %v838_v45 = vadd.f32 %v4681_v48, %v363_v33  ;;  %v4097_v54 = vld [vmem:[#allocation8 + $0x238] sm:$0xff]   ;;  %v4099_v48 = vld [vmem:[#allocation8 + $0x270] sm:$0xff]   ;;  %v4119_v33 = vld [vmem:[#allocation8 + $0x248] sm:$0xff]  }
 0x140   : > { %v4685_v9 = vpop.f32.mrf.mxu0  ;;  %v4687_v14 = vpop.f32.mrf.mxu1  ;;  %v4100_v57 = vld [vmem:[#allocation8 + $0x2f0] sm:$0xff]  }
 0x141   : > { %3729 = vmatpush3.bf16.msra.mxu0 %v4069_v49  ;;  %v1234_v60 = vpack.c.bf16 %v840_v56, %v836_v50  ;;  %3751 = vmatpush3.bf16.msra.mxu1 %v4070_v52  ;;  %v1236_v63 = vpack.c.bf16 %v883_v58, %v879_v53  ;;  %v4096_v49 = vld [vmem:[#allocation8 + $0x2f8] sm:$0xff]   ;;  %v1235_v56 = vpack.c.bf16 %v881_v47, %v877_v46 }
 0x142   : > { %3730 = vmatprep.subr.bf16.mxu0 %v4071_v25  ;;  %3752 = vmatprep.subr.bf16.mxu1 %v4072_v55  ;;  %v921_v18 = vpop.f32.mrf.mxu0  ;;  %v964_v20 = vpop.f32.mrf.mxu1  ;;  %v1233_v55 = vpack.c.bf16 %v838_v45, %v834_v44  ;;  %v399_v44 = vrot.slane %v4695_v29, %v4668_v22  ;;  %v407_v45 = vrot.slane %v4695_v29, %v4671_v26 }
 0x143   : > { %2910 = vmatprep.mubr.bf16.mxu0 %v1234_v60  ;;  %2951 = vmatprep.mubr.bf16.mxu1 %v1236_v63  ;;  %v922_v50 = vadd.f32 %v921_v18, %v383_v38  ;;  %v965_v25 = vadd.f32 %v964_v20, %v391_v40  ;;  %v4103_v60 = vld [vmem:[#allocation8 + $0x268] sm:$0xff]   ;;  %v4114_v18 = vld [vmem:[#allocation8 + $0x298] sm:$0xff]   ;;  %v4116_v20 = vld [vmem:[#allocation8 + $0x2d0] sm:$0xff]  }
 0x144   : > { %v4697_v30 = vpop.f32.mrf.mxu0  ;;  %v4699_v32 = vpop.f32.mrf.mxu1  ;;  %v4106_v63 = vld [vmem:[#allocation8 + $0x2a8] sm:$0xff]  }
 0x145   : > { %3731 = vmatpush3.bf16.msra.mxu0 %v4073_v59  ;;  %3753 = vmatpush3.bf16.msra.mxu1 %v4074_v61  ;;  %v4102_v59 = vld [vmem:[#allocation8 + $0x2b0] sm:$0xff]   ;;  %v4104_v61 = vld [vmem:[#allocation8 + $0x2e8] sm:$0xff]  }
 0x146   : > { %3732 = vmatprep.subr.bf16.mxu0 %v4075_v62  ;;  %3754 = vmatprep.subr.bf16.mxu1 %v4076_v1  ;;  %v925_v41 = vpop.f32.mrf.mxu0  ;;  %v968_v43 = vpop.f32.mrf.mxu1  ;;  %v4105_v62 = vld [vmem:[#allocation8 + $0x228] sm:$0xff]   ;;  %v4107_v1 = vld [vmem:[#allocation8 + $0x260] sm:$0xff]  }
 0x147   : > { %v926_v52 = vadd.f32 %v925_v41, %v383_v38  ;;  %v969_v53 = vadd.f32 %v968_v43, %v391_v40  ;;  %v379_v38 = vrot.slane %v4695_v29, %v4649_v8  ;;  %v4122_v40 = vld [vmem:[#allocation8 + $0x288] sm:$0xff]   ;;  %v4123_v41 = vld [vmem:[#allocation8 + $0x240] sm:$0xff]  }
 0x148   : > { %v4124_v43 = vld [vmem:[#allocation8 + $0x2c0] sm:$0xff]  }
 0x149   : > { %3733 = vmatpush3.bf16.msra.mxu0 %v4077_v2  ;;  %3755 = vmatpush3.bf16.msra.mxu1 %v4078_v3  ;;  %v1238_v58 = vpack.c.bf16 %v926_v52, %v922_v50  ;;  %v1240_v39 = vpack.c.bf16 %v969_v53, %v965_v25  ;;  %v4108_v2 = vld [vmem:[#allocation8 + $0x2e0] sm:$0xff]   ;;  %v920_v47 = vadd.f32 %v4685_v9, %v379_v38  ;;  %v4127_v52 = vld [vmem:[#allocation8 + $0x378] sm:$0xff]  }
 0x14a   : > { %3734 = vmatprep.subr.bf16.mxu0 %v4079_v4  ;;  %3756 = vmatprep.subr.bf16.mxu1 %v4080_v5  ;;  %v4109_v3 = vld [vmem:[#allocation8 + $0x220] sm:$0xff]   ;;  %v4111_v5 = vld [vmem:[#allocation8 + $0x258] sm:$0xff]  }
 0x14b   : > { %v4110_v4 = vld [vmem:[#allocation8 + $0x2a0] sm:$0xff]   ;;  %v4130_v9 = vld [vmem:[#allocation8 + $0x3b8] sm:$0xff]  }
 0x14c   : > { %v4126_v50 = vld [vmem:[#allocation8 + $0x280] sm:$0xff]  }
 0x14d   : > { %3735 = vmatpush3.bf16.msra.mxu0 %v4081_v13  ;;  %3757 = vmatpush3.bf16.msra.mxu1 %v4082_v15  ;;  %v4112_v13 = vld [vmem:[#allocation8 + $0x2d8] sm:$0xff]   ;;  %v4713_v15 = vpop.f32.mrf.mxu0 }
 0x14e   : > { %3736 = vmatprep.subr.bf16.mxu0 %v4083_v16  ;;  %3758 = vmatprep.subr.bf16.mxu1 %v4084_v17  ;;  %v4113_v16 = vld [vmem:[#allocation8 + $0x218] sm:$0xff]   ;;  %v4715_v17 = vpop.f32.mrf.mxu1 }
 0x151   : > { %3737 = vmatpush3.bf16.msra.mxu0 %v4085_v19  ;;  %3759 = vmatpush3.bf16.msra.mxu1 %v4086_v23  ;;  %v4115_v19 = vld [vmem:[#allocation8 + $0x250] sm:$0xff]   ;;  %v1007_v23 = vpop.f32.mrf.mxu0 }
 0x152   : > { %3738 = vmatprep.subr.bf16.mxu0 %v4087_v24  ;;  %3760 = vmatprep.subr.bf16.mxu1 %v4088_v28  ;;  %v4117_v24 = vld [vmem:[#allocation8 + $0x210] sm:$0xff]   ;;  %v1050_v28 = vpop.f32.mrf.mxu1 }
 0x155   : > { %3739 = vmatpush3.bf16.msra.mxu0 %v4089_v31  ;;  %3761 = vmatpush3.bf16.msra.mxu1 %v4090_v35  ;;  %v4118_v31 = vld [vmem:[#allocation8 + $0x290] sm:$0xff]   ;;  %v4120_v35 = vld [vmem:[#allocation8 + $0x2c8] sm:$0xff]  }
 0x156   : > { %3740 = vmatprep.subr.bf16.mxu0 %v4091_v36  ;;  %3762 = vmatprep.subr.bf16.mxu1 %v4092_v37  ;;  %v4717_v36 = vpop.f32.mrf.mxu0  ;;  %v4719_v37 = vpop.f32.mrf.mxu1 }
 0x158   : > { %v1054_v46 = vpop.f32.mrf.mxu1 }
 0x159   : > { %3741 = vmatpush3.bf16.msra.mxu0 %v4093_v42  ;;  %3763 = vmatpush3.bf16.msra.mxu1 %v4094_v0  ;;  %v387_v42 = vrot.slane %v4695_v29, %v4657_v12  ;;  %v1011_v0 = vpop.f32.mrf.mxu0 }
 0x15a   : > { %3770 = vmatprep.subr.bf16.mxu0 %v4095_v11  ;;  %3792 = vmatprep.subr.bf16.mxu1 %v4096_v49  ;;  %v4125_v11 = vld [vmem:[#allocation8 + $0x200] sm:$0xff]   ;;  %v924_v49 = vadd.f32 %v4697_v30, %v379_v38  ;;  %v4131_v30 = vld [vmem:[#allocation8 + $0x370] sm:$0xff]   ;;  %v4151_v38 = vld [vmem:[#allocation8 + $0x348] sm:$0xff]  }
 0x15b   : > { %v963_v25 = vadd.f32 %v4687_v14, %v387_v42  ;;  %v967_v53 = vadd.f32 %v4699_v32, %v387_v42  ;;  %v4133_v32 = vld [vmem:[#allocation8 + $0x330] sm:$0xff]  }
 0x15c   : > { %2911 = vmatmul.mubr.bf16.vlgmr.msra.gmra.mxu0 %v1233_v55  ;;  %2952 = vmatmul.mubr.bf16.vlgmr.msra.gmra.mxu1 %v1235_v56  ;;  %v1008_v55 = vadd.f32 %v1007_v23, %v399_v44  ;;  %v1055_v56 = vadd.f32 %v1054_v46, %v407_v45  ;;  %v4146_v23 = vld [vmem:[#allocation8 + $0x398] sm:$0xff]   ;;  %v403_v46 = vrot.slane %v4695_v29, %v4693_v27 }
 0x15d   : > { %3771 = vmatpush3.bf16.msra.mxu0 %v4097_v54  ;;  %3793 = vmatpush3.bf16.msra.mxu1 %v4098_v34  ;;  %v4128_v54 = vld [vmem:[#allocation8 + $0x3f8] sm:$0xff]   ;;  %v1012_v34 = vadd.f32 %v1011_v0, %v399_v44  ;;  %v4154_v0 = vld [vmem:[#allocation8 + $0x388] sm:$0xff]  }
 0x15e   : > { %3772 = vmatprep.subr.bf16.mxu0 %v4099_v48  ;;  %3794 = vmatprep.subr.bf16.mxu1 %v4100_v57  ;;  %v1051_v48 = vadd.f32 %v1050_v28, %v407_v45  ;;  %v4129_v57 = vld [vmem:[#allocation8 + $0x338] sm:$0xff]   ;;  %v4148_v28 = vld [vmem:[#allocation8 + $0x3d0] sm:$0xff]   ;;  %v395_v45 = vrot.slane %v4695_v29, %v4690_v21 }
 0x15f   : > { %2992 = vmatprep.mubr.bf16.mxu0 %v1238_v58  ;;  %3033 = vmatprep.mubr.bf16.mxu1 %v1240_v39  ;;  %v1237_v58 = vpack.c.bf16 %v924_v49, %v920_v47  ;;  %v1239_v39 = vpack.c.bf16 %v967_v53, %v963_v25  ;;  %v4156_v47 = vld [vmem:[#allocation8 + $0x3c0] sm:$0xff]   ;;  %v4159_v29 = vld [vmem:[#allocation8 + $0x478] sm:$0xff]  }
 0x160   : > { %v1244_v14 = vpack.c.bf16 %v1055_v56, %v1051_v48  ;;  %v4157_v25 = vld [vmem:[#allocation8 + $0x300] sm:$0xff]   ;;  %v1049_v48 = vadd.f32 %v4715_v17, %v403_v46  ;;  %v1053_v56 = vadd.f32 %v4719_v37, %v403_v46  ;;  %v4165_v37 = vld [vmem:[#allocation8 + $0x430] sm:$0xff]  }
 0x161   : > { %3773 = vmatpush3.bf16.msra.mxu0 %v4101_v51  ;;  %3795 = vmatpush3.bf16.msra.mxu1 %v4102_v59  ;;  %v4132_v51 = vld [vmem:[#allocation8 + $0x3f0] sm:$0xff]   ;;  %v1242_v59 = vpack.c.bf16 %v1012_v34, %v1008_v55  ;;  %v1010_v55 = vadd.f32 %v4717_v36, %v395_v45  ;;  %v4158_v34 = vld [vmem:[#allocation8 + $0x380] sm:$0xff]  }
 0x162   : > { %3774 = vmatprep.subr.bf16.mxu0 %v4103_v60  ;;  %3796 = vmatprep.subr.bf16.mxu1 %v4104_v61  ;;  %v4134_v60 = vld [vmem:[#allocation8 + $0x3b0] sm:$0xff]   ;;  %v4135_v61 = vld [vmem:[#allocation8 + $0x368] sm:$0xff]  }
 0x163   : > { %v4163_v36 = vld [vmem:[#allocation8 + $0x470] sm:$0xff]  }
 0x165   : > { %3775 = vmatpush3.bf16.msra.mxu0 %v4105_v62  ;;  %3797 = vmatpush3.bf16.msra.mxu1 %v4106_v63  ;;  %v4136_v62 = vld [vmem:[#allocation8 + $0x3e8] sm:$0xff]  }
 0x166   : > { %3776 = vmatprep.subr.bf16.mxu0 %v4107_v1  ;;  %3798 = vmatprep.subr.bf16.mxu1 %v4108_v2  ;;  %v4137_v63 = vld [vmem:[#allocation8 + $0x328] sm:$0xff]   ;;  %v4139_v2 = vld [vmem:[#allocation8 + $0x360] sm:$0xff]  }
 0x167   : > { %v4138_v1 = vld [vmem:[#allocation8 + $0x3a8] sm:$0xff]  }
 0x169   : > { %3777 = vmatpush3.bf16.msra.mxu0 %v4109_v3  ;;  %3799 = vmatpush3.bf16.msra.mxu1 %v4110_v4  ;;  %v4140_v3 = vld [vmem:[#allocation8 + $0x3e0] sm:$0xff]  }
 0x16a   : > { %3778 = vmatprep.subr.bf16.mxu0 %v4111_v5  ;;  %3800 = vmatprep.subr.bf16.mxu1 %v4112_v13  ;;  %v4141_v4 = vld [vmem:[#allocation8 + $0x320] sm:$0xff]   ;;  %v4143_v13 = vld [vmem:[#allocation8 + $0x358] sm:$0xff]  }
 0x16b   : > { %v4142_v5 = vld [vmem:[#allocation8 + $0x3a0] sm:$0xff]  }
 0x16d   : > { %3779 = vmatpush3.bf16.msra.mxu0 %v4113_v16  ;;  %3801 = vmatpush3.bf16.msra.mxu1 %v4114_v18  ;;  %v4144_v16 = vld [vmem:[#allocation8 + $0x3d8] sm:$0xff]   ;;  %v4733_v18 = vpop.f32.mrf.mxu0 }
 0x16e   : > { %3780 = vmatprep.subr.bf16.mxu0 %v4115_v19  ;;  %3802 = vmatprep.subr.bf16.mxu1 %v4116_v20  ;;  %v4145_v19 = vld [vmem:[#allocation8 + $0x318] sm:$0xff]   ;;  %v4735_v20 = vpop.f32.mrf.mxu1 }
 0x171   : > { %3781 = vmatpush3.bf16.msra.mxu0 %v4117_v24  ;;  %3803 = vmatpush3.bf16.msra.mxu1 %v4118_v31  ;;  %v4147_v24 = vld [vmem:[#allocation8 + $0x350] sm:$0xff]   ;;  %v1093_v31 = vpop.f32.mrf.mxu0 }
 0x172   : > { %3782 = vmatprep.subr.bf16.mxu0 %v4119_v33  ;;  %3804 = vmatprep.subr.bf16.mxu1 %v4120_v35  ;;  %v4149_v33 = vld [vmem:[#allocation8 + $0x310] sm:$0xff]   ;;  %v1136_v35 = vpop.f32.mrf.mxu1 }
 0x173   : > { %v4739_v42 = vpop.f32.mrf.mxu0 }
 0x174   : > { %v4741_v44 = vpop.f32.mrf.mxu1 }
 0x175   : > { %3783 = vmatpush3.bf16.msra.mxu0 %v4121_v6  ;;  %3805 = vmatpush3.bf16.msra.mxu1 %v4122_v40  ;;  %v4150_v6 = vld [vmem:[#allocation8 + $0x390] sm:$0xff]   ;;  %v4152_v40 = vld [vmem:[#allocation8 + $0x3c8] sm:$0xff]  }
 0x176   : > { %3784 = vmatprep.subr.bf16.mxu0 %v4123_v41  ;;  %3806 = vmatprep.subr.bf16.mxu1 %v4124_v43  ;;  %v4737_v41 = vld [vmem:[#allocation7 + $0x10] sm:$0xff]  ;;  %v4153_v43 = vld [vmem:[#allocation8 + $0x308] sm:$0xff]   ;;  %v1140_v53 = vpop.f32.mrf.mxu1 }
 0x177   : > { %v415_v49 = vrot.slane %v4737_v41, %v4646_v7  ;;  %v4160_v7 = vld [vmem:[#allocation8 + $0x4f8] sm:$0xff]   ;;  %v411_v46 = vrot.slane %v4737_v41, %v4649_v8 }
 0x179   : > { %3785 = vmatpush3.bf16.msra.mxu0 %v4125_v11  ;;  %3807 = vmatpush3.bf16.msra.mxu1 %v4126_v50  ;;  %v4155_v11 = vld [vmem:[#allocation8 + $0x340] sm:$0xff]   ;;  %v423_v50 = vrot.slane %v4737_v41, %v4652_v10  ;;  %v1092_v8 = vadd.f32 %v4733_v18, %v411_v46  ;;  %v4194_v18 = vld [vmem:[#allocation8 + $0x5b8] sm:$0xff]  }
 0x17a   : > { %3814 = vmatprep.subr.bf16.mxu0 %v4127_v52  ;;  %3836 = vmatprep.subr.bf16.mxu1 %v4128_v54  ;;  %v1097_v52 = vpop.f32.mrf.mxu0  ;;  %v1006_v54 = vadd.f32 %v4713_v15, %v395_v45  ;;  %v4162_v15 = vld [vmem:[#allocation8 + $0x4b8] sm:$0xff]  }
 0x17b   : > { %v1098_v10 = vadd.f32 %v1097_v52, %v415_v49  ;;  %v4188_v52 = vld [vmem:[#allocation8 + $0x4c0] sm:$0xff]  }
 0x17c   : > { %2993 = vmatmul.mubr.bf16.vlgmr.msra.gmra.mxu0 %v1237_v58  ;;  %3034 = vmatmul.mubr.bf16.vlgmr.msra.gmra.mxu1 %v1239_v39  ;;  %v1137_v58 = vadd.f32 %v1136_v35, %v423_v50  ;;  %v1241_v39 = vpack.c.bf16 %v1010_v55, %v1006_v54  ;;  %v4181_v35 = vld [vmem:[#allocation8 + $0x410] sm:$0xff]   ;;  %v4189_v55 = vld [vmem:[#allocation8 + $0x400] sm:$0xff]  }
 0x17d   : > { %3815 = vmatpush3.bf16.msra.mxu0 %v4129_v57  ;;  %3837 = vmatpush3.bf16.msra.mxu1 %v4130_v9  ;;  %v1094_v57 = vadd.f32 %v1093_v31, %v415_v49  ;;  %v1141_v9 = vadd.f32 %v1140_v53, %v423_v50  ;;  %v4180_v31 = vld [vmem:[#allocation8 + $0x4d0] sm:$0xff]   ;;  %v4187_v49 = vld [vmem:[#allocation8 + $0x440] sm:$0xff]   ;;  %v419_v50 = vrot.slane %v4737_v41, %v4657_v12  ;;  %v4191_v12 = vld [vmem:[#allocation8 + $0x578] sm:$0xff]  }
 0x17e   : > { %3816 = vmatprep.subr.bf16.mxu0 %v4131_v30  ;;  %3838 = vmatprep.subr.bf16.mxu1 %v4132_v51  ;;  %v4161_v30 = vld [vmem:[#allocation8 + $0x438] sm:$0xff]   ;;  %v1243_v51 = vpack.c.bf16 %v1053_v56, %v1049_v48  ;;  %v439_v53 = vrot.slane %v4737_v41, %v4671_v26  ;;  %v4190_v48 = vld [vmem:[#allocation8 + $0x480] sm:$0xff]  }
 0x17f   : > { %3074 = vmatprep.mubr.bf16.mxu0 %v1242_v59  ;;  %3115 = vmatprep.mubr.bf16.mxu1 %v1244_v14  ;;  %v4164_v59 = vld [vmem:[#allocation8 + $0x4f0] sm:$0xff]   ;;  %v1246_v14 = vpack.c.bf16 %v1098_v10, %v1094_v57  ;;  %v1248_v17 = vpack.c.bf16 %v1141_v9, %v1137_v58  ;;  %v1135_v56 = vadd.f32 %v4735_v20, %v419_v50  ;;  %v4193_v9 = vld [vmem:[#allocation8 + $0x538] sm:$0xff]  }
 0x181   : > { %3817 = vmatpush3.bf16.msra.mxu0 %v4133_v32  ;;  %3839 = vmatpush3.bf16.msra.mxu1 %v4134_v60  ;;  %v4166_v32 = vld [vmem:[#allocation8 + $0x4b0] sm:$0xff]   ;;  %v4167_v60 = vld [vmem:[#allocation8 + $0x468] sm:$0xff]  }
 0x182   : > { %3818 = vmatprep.subr.bf16.mxu0 %v4135_v61  ;;  %3840 = vmatprep.subr.bf16.mxu1 %v4136_v62  ;;  %v4168_v61 = vld [vmem:[#allocation8 + $0x4e8] sm:$0xff]  }
 0x183   : > { %v4169_v62 = vld [vmem:[#allocation8 + $0x428] sm:$0xff]  }
 0x185   : > { %3819 = vmatpush3.bf16.msra.mxu0 %v4137_v63  ;;  %3841 = vmatpush3.bf16.msra.mxu1 %v4138_v1  ;;  %v4170_v63 = vld [vmem:[#allocation8 + $0x4a8] sm:$0xff]   ;;  %v4171_v1 = vld [vmem:[#allocation8 + $0x460] sm:$0xff]  }
 0x186   : > { %3820 = vmatprep.subr.bf16.mxu0 %v4139_v2  ;;  %3842 = vmatprep.subr.bf16.mxu1 %v4140_v3  ;;  %v4172_v2 = vld [vmem:[#allocation8 + $0x4e0] sm:$0xff]  }
 0x187   : > { %v4173_v3 = vld [vmem:[#allocation8 + $0x420] sm:$0xff]  }
 0x189   : > { %3821 = vmatpush3.bf16.msra.mxu0 %v4141_v4  ;;  %3843 = vmatpush3.bf16.msra.mxu1 %v4142_v5  ;;  %v4174_v4 = vld [vmem:[#allocation8 + $0x4a0] sm:$0xff]   ;;  %v4175_v5 = vld [vmem:[#allocation8 + $0x458] sm:$0xff]  }
 0x18a   : > { %3822 = vmatprep.subr.bf16.mxu0 %v4143_v13  ;;  %3844 = vmatprep.subr.bf16.mxu1 %v4144_v16  ;;  %v4176_v13 = vld [vmem:[#allocation8 + $0x4d8] sm:$0xff]   ;;  %v4755_v16 = vpop.f32.mrf.mxu0 }
 0x18d   : > { %3823 = vmatpush3.bf16.msra.mxu0 %v4145_v19  ;;  %3845 = vmatpush3.bf16.msra.mxu1 %v4146_v23  ;;  %v4177_v19 = vld [vmem:[#allocation8 + $0x418] sm:$0xff]   ;;  %v4757_v23 = vpop.f32.mrf.mxu1 }
 0x18e   : > { %3824 = vmatprep.subr.bf16.mxu0 %v4147_v24  ;;  %3846 = vmatprep.subr.bf16.mxu1 %v4148_v28  ;;  %v4178_v24 = vld [vmem:[#allocation8 + $0x498] sm:$0xff]   ;;  %v4179_v28 = vld [vmem:[#allocation8 + $0x450] sm:$0xff]  }
 0x191   : > { %3825 = vmatpush3.bf16.msra.mxu0 %v4149_v33  ;;  %3847 = vmatpush3.bf16.msra.mxu1 %v4150_v6  ;;  %v1179_v33 = vpop.f32.mrf.mxu0  ;;  %v1222_v6 = vpop.f32.mrf.mxu1 }
 0x192   : > { %3826 = vmatprep.subr.bf16.mxu0 %v4151_v38  ;;  %3848 = vmatprep.subr.bf16.mxu1 %v4152_v40  ;;  %v4182_v38 = vld [vmem:[#allocation8 + $0x490] sm:$0xff]   ;;  %v4183_v40 = vld [vmem:[#allocation8 + $0x448] sm:$0xff]   ;;  %v1223_v10 = vadd.f32 %v1222_v6, %v439_v53  ;;  %v4219_v6 = vld [vmem:[#allocation8 + $0x540] sm:$0xff]  }
 0x193   : > { %v4759_v45 = vpop.f32.mrf.mxu0 }
 0x195   : > { %3827 = vmatpush3.bf16.msra.mxu0 %v4153_v43  ;;  %3849 = vmatpush3.bf16.msra.mxu1 %v4154_v0  ;;  %v4184_v43 = vld [vmem:[#allocation8 + $0x4c8] sm:$0xff]   ;;  %v1183_v54 = vpop.f32.mrf.mxu0 }
 0x196   : > { %3828 = vmatprep.subr.bf16.mxu0 %v4155_v11  ;;  %3850 = vmatprep.subr.bf16.mxu1 %v4156_v47  ;;  %v4185_v0 = vld [vmem:[#allocation8 + $0x408] sm:$0xff]   ;;  %v4761_v11 = vpop.f32.mrf.mxu1 }
 0x197   : > { %v4186_v47 = vld [vmem:[#allocation8 + $0x488] sm:$0xff]  }
 0x199   : > { %3829 = vmatpush3.bf16.msra.mxu0 %v4157_v25  ;;  %3851 = vmatpush3.bf16.msra.mxu1 %v4158_v34  ;;  %v431_v25 = vrot.slane %v4737_v41, %v4668_v22  ;;  %v1226_v34 = vpop.f32.mrf.mxu1  ;;  %v4192_v22 = vld [vmem:[#allocation8 + $0x5f8] sm:$0xff]  }
 0x19a   : > { %3858 = vmatprep.subr.bf16.mxu0 %v4159_v29  ;;  %3880 = vmatprep.subr.bf16.mxu1 %v4160_v7  ;;  %v1096_v29 = vadd.f32 %v4739_v42, %v411_v46  ;;  %v1139_v7 = vadd.f32 %v4741_v44, %v419_v50  ;;  %v1227_v58 = vadd.f32 %v1226_v34, %v439_v53  ;;  %v4195_v42 = vld [vmem:[#allocation8 + $0x570] sm:$0xff]  }
 0x19b   : > { %v1180_v57 = vadd.f32 %v1179_v33, %v431_v25  ;;  %v1184_v26 = vadd.f32 %v1183_v54, %v431_v25  ;;  %v4197_v44 = vld [vmem:[#allocation8 + $0x530] sm:$0xff]   ;;  %v427_v33 = vrot.slane %v4737_v41, %v4690_v21 }
 0x19c   : > { %3075 = vmatmul.mubr.bf16.vlgmr.msra.gmra.mxu0 %v1241_v39  ;;  %3116 = vmatmul.mubr.bf16.vlgmr.msra.gmra.mxu1 %v1243_v51  ;;  %v1247_v39 = vpack.c.bf16 %v1139_v7, %v1135_v56  ;;  %v1252_v20 = vpack.c.bf16 %v1227_v58, %v1223_v10  ;;  %v4198_v51 = vld [vmem:[#allocation8 + $0x5b0] sm:$0xff]  }
 0x19d   : > { %3859 = vmatpush3.bf16.msra.mxu0 %v4161_v30  ;;  %3881 = vmatpush3.bf16.msra.mxu1 %v4162_v15  ;;  %v1245_v30 = vpack.c.bf16 %v1096_v29, %v1092_v8  ;;  %v4196_v15 = vld [vmem:[#allocation8 + $0x5f0] sm:$0xff]   ;;  %v1182_v46 = vadd.f32 %v4759_v45, %v427_v33 }
 0x19e   : > { %3860 = vmatprep.subr.bf16.mxu0 %v4163_v36  ;;  %3882 = vmatprep.subr.bf16.mxu1 %v4164_v59  ;;  %v1250_v36 = vpack.c.bf16 %v1184_v26, %v1180_v57  ;;  %v4199_v59 = vld [vmem:[#allocation8 + $0x568] sm:$0xff]  }
 0x19f   : > { %3156 = vmatprep.mubr.bf16.mxu0 %v1246_v14  ;;  %3197 = vmatprep.mubr.bf16.mxu1 %v1248_v17  ;;  %v4200_v14 = vld [vmem:[#allocation8 + $0x5e8] sm:$0xff]  }
 0x1a0   : > { %v4201_v17 = vld [vmem:[#allocation8 + $0x528] sm:$0xff]  }
 0x1a1   : > { %3861 = vmatpush3.bf16.msra.mxu0 %v4165_v37  ;;  %3883 = vmatpush3.bf16.msra.mxu1 %v4166_v32  ;;  %v4202_v37 = vld [vmem:[#allocation8 + $0x5a8] sm:$0xff]   ;;  %v4203_v32 = vld [vmem:[#allocation8 + $0x560] sm:$0xff]  }
 0x1a2   : > { %3862 = vmatprep.subr.bf16.mxu0 %v4167_v60  ;;  %3884 = vmatprep.subr.bf16.mxu1 %v4168_v61  ;;  %v4204_v60 = vld [vmem:[#allocation8 + $0x5e0] sm:$0xff]  }
 0x1a3   : > { %v4205_v61 = vld [vmem:[#allocation8 + $0x520] sm:$0xff]  }
 0x1a5   : > { %3863 = vmatpush3.bf16.msra.mxu0 %v4169_v62  ;;  %3885 = vmatpush3.bf16.msra.mxu1 %v4170_v63  ;;  %v4206_v62 = vld [vmem:[#allocation8 + $0x5a0] sm:$0xff]   ;;  %v4207_v63 = vld [vmem:[#allocation8 + $0x558] sm:$0xff]  }
 0x1a6   : > { %3864 = vmatprep.subr.bf16.mxu0 %v4171_v1  ;;  %3886 = vmatprep.subr.bf16.mxu1 %v4172_v2  ;;  %v4208_v1 = vld [vmem:[#allocation8 + $0x5d8] sm:$0xff]  }
 0x1a7   : > { %v4209_v2 = vld [vmem:[#allocation8 + $0x518] sm:$0xff]  }
 0x1a9   : > { %3865 = vmatpush3.bf16.msra.mxu0 %v4173_v3  ;;  %3887 = vmatpush3.bf16.msra.mxu1 %v4174_v4  ;;  %v4210_v3 = vld [vmem:[#allocation8 + $0x598] sm:$0xff]   ;;  %v4211_v4 = vld [vmem:[#allocation8 + $0x550] sm:$0xff]  }
 0x1aa   : > { %3866 = vmatprep.subr.bf16.mxu0 %v4175_v5  ;;  %3888 = vmatprep.subr.bf16.mxu1 %v4176_v13  ;;  %v4212_v5 = vld [vmem:[#allocation8 + $0x5d0] sm:$0xff]  }
 0x1ab   : > { %v4213_v13 = vld [vmem:[#allocation8 + $0x510] sm:$0xff]  }
 0x1ad   : > { %3867 = vmatpush3.bf16.msra.mxu0 %v4177_v19  ;;  %3889 = vmatpush3.bf16.msra.mxu1 %v4178_v24  ;;  %v4214_v19 = vld [vmem:[#allocation8 + $0x590] sm:$0xff]   ;;  %v4215_v24 = vld [vmem:[#allocation8 + $0x548] sm:$0xff]  }
 0x1ae   : > { %3868 = vmatprep.subr.bf16.mxu0 %v4179_v28  ;;  %3890 = vmatprep.subr.bf16.mxu1 %v4180_v31  ;;  %v4216_v28 = vld [vmem:[#allocation8 + $0x5c8] sm:$0xff]  }
 0x1af   : > { %v4217_v31 = vld [vmem:[#allocation8 + $0x508] sm:$0xff]  }
 0x1b1   : > { %3869 = vmatpush3.bf16.msra.mxu0 %v4181_v35  ;;  %3891 = vmatpush3.bf16.msra.mxu1 %v4182_v38  ;;  %v4218_v35 = vld [vmem:[#allocation8 + $0x588] sm:$0xff]   ;;  %v435_v38 = vrot.slane %v4737_v41, %v4693_v27 }
 0x1b2   : > { %3870 = vmatprep.subr.bf16.mxu0 %v4183_v40  ;;  %3892 = vmatprep.subr.bf16.mxu1 %v4184_v43  ;;  %v4220_v40 = vld [vmem:[#allocation8 + $0x5c0] sm:$0xff]  }
 0x1b3   : > { %v4221_v43 = vld [vmem:[#allocation8 + $0x500] sm:$0xff]   ;;  %v1221_v21 = vadd.f32 %v4757_v23, %v435_v38 }
 0x1b5   : > { %3871 = vmatpush3.bf16.msra.mxu0 %v4185_v0  ;;  %3893 = vmatpush3.bf16.msra.mxu1 %v4186_v47  ;;  %v1178_v0 = vadd.f32 %v4755_v16, %v427_v33  ;;  %v4222_v47 = vld [vmem:[#allocation8 + $0x580] sm:$0xff]  }
 0x1b6   : > { %3872 = vmatprep.subr.bf16.mxu0 %v4187_v49  ;;  %3894 = vmatprep.subr.bf16.mxu1 %v4188_v52  ;;  %v1225_v49 = vadd.f32 %v4761_v11, %v435_v38 }
 0x1b7   : > { %v1249_v50 = vpack.c.bf16 %v1182_v46, %v1178_v0 }
 0x1b8   : > { %v1251_v27 = vpack.c.bf16 %v1225_v49, %v1221_v21 }
 0x1b9   : > { %3873 = vmatpush3.bf16.msra.mxu0 %v4189_v55  ;;  %3895 = vmatpush3.bf16.msra.mxu1 %v4190_v48 }
 0x1ba   : > { %3902 = vmatprep.subr.bf16.mxu0 %v4191_v12  ;;  %3924 = vmatprep.subr.bf16.mxu1 %v4192_v22 }
 0x1bc   : > { %3157 = vmatmul.mubr.bf16.vlgmr.msra.gmra.mxu0 %v1245_v30  ;;  %3198 = vmatmul.mubr.bf16.vlgmr.msra.gmra.mxu1 %v1247_v39  ;;  %v3482_v39 = vld [vmem:[%s4840_s4] ss:$0 sm:$0xff] }
 0x1bd   : > { %3903 = vmatpush3.bf16.msra.mxu0 %v4193_v9  ;;  %3925 = vmatpush3.bf16.msra.mxu1 %v4194_v18 }
 0x1be   : > { %3904 = vmatprep.subr.bf16.mxu0 %v4195_v42  ;;  %3926 = vmatprep.subr.bf16.mxu1 %v4196_v15 }
 0x1bf   : > { %3238 = vmatprep.mubr.bf16.mxu0 %v1250_v36  ;;  %3279 = vmatprep.mubr.bf16.mxu1 %v1252_v20 }
 0x1c1   : > { %3905 = vmatpush3.bf16.msra.mxu0 %v4197_v44  ;;  %3927 = vmatpush3.bf16.msra.mxu1 %v4198_v51 }
 0x1c2   : > { %3906 = vmatprep.subr.bf16.mxu0 %v4199_v59  ;;  %3928 = vmatprep.subr.bf16.mxu1 %v4200_v14 }
 0x1c5   : > { %3907 = vmatpush3.bf16.msra.mxu0 %v4201_v17  ;;  %3929 = vmatpush3.bf16.msra.mxu1 %v4202_v37 }
 0x1c6   : > { %3908 = vmatprep.subr.bf16.mxu0 %v4203_v32  ;;  %3930 = vmatprep.subr.bf16.mxu1 %v4204_v60 }
 0x1c9   : > { %3909 = vmatpush3.bf16.msra.mxu0 %v4205_v61  ;;  %3931 = vmatpush3.bf16.msra.mxu1 %v4206_v62 }
 0x1ca   : > { %3910 = vmatprep.subr.bf16.mxu0 %v4207_v63  ;;  %3932 = vmatprep.subr.bf16.mxu1 %v4208_v1 }
 0x1cd   : > { %3911 = vmatpush3.bf16.msra.mxu0 %v4209_v2  ;;  %3933 = vmatpush3.bf16.msra.mxu1 %v4210_v3 }
 0x1ce   : > { %3912 = vmatprep.subr.bf16.mxu0 %v4211_v4  ;;  %3934 = vmatprep.subr.bf16.mxu1 %v4212_v5 }
 0x1d1   : > { %3913 = vmatpush3.bf16.msra.mxu0 %v4213_v13  ;;  %3935 = vmatpush3.bf16.msra.mxu1 %v4214_v19 }
 0x1d2   : > { %3914 = vmatprep.subr.bf16.mxu0 %v4215_v24  ;;  %3936 = vmatprep.subr.bf16.mxu1 %v4216_v28 }
 0x1d5   : > { %3915 = vmatpush3.bf16.msra.mxu0 %v4217_v31  ;;  %3937 = vmatpush3.bf16.msra.mxu1 %v4218_v35 }
 0x1d6   : > { %3916 = vmatprep.subr.bf16.mxu0 %v4219_v6  ;;  %3938 = vmatprep.subr.bf16.mxu1 %v4220_v40 }
 0x1d9   : > { %3917 = vmatpush3.bf16.msra.mxu0 %v4221_v43  ;;  %3939 = vmatpush3.bf16.msra.mxu1 %v4222_v47 }
 0x1dc   : > { %3239 = vmatmul.mubr.bf16.vlgmr.msra.gmra.mxu0 %v1249_v50  ;;  %3280 = vmatmul.mubr.bf16.vlgmr.msra.gmra.mxu1 %v1251_v27 }
 0x1fc   : > { %v3698_v41 = vpop.f32.mrf.mxu0  ;;  %v3720_v52 = vpop.f32.mrf.mxu1 }
 0x1fe   : > { %v3699_v25 = vpop.f32.mrf.mxu0  ;;  %v3721_v16 = vpop.f32.mrf.mxu1 }
 0x1ff   : > { %v3700_v18 = vadd.f32 %v3699_v25, %v3698_v41  ;;  %v3722_v51 = vadd.f32 %v3721_v16, %v3720_v52 }
 0x200   : > { %v3701_v53 = vpop.f32.mrf.mxu0  ;;  %v3723_v45 = vpop.f32.mrf.mxu1 }
 0x201   : > { %v2831_v20 = vadd.f32 %v3700_v18, %v3482_v39 }
 0x202   : > { %v3702_v54 = vpop.f32.mrf.mxu0  ;;  %v3724_v34 = vpop.f32.mrf.mxu1 }
 0x203   : > { %v3703_v44 = vadd.f32 %v3702_v54, %v3701_v53  ;;  %v2872_v37 = vadd.f32 %v3722_v51, %v2831_v20  ;;  %v3725_v60 = vadd.f32 %v3724_v34, %v3723_v45 }
 0x205   : > { %v2834_v32 = vadd.f32 %v3703_v44, %v3482_v39 }
 0x207   : > { %v2875_v2 = vadd.f32 %v3725_v60, %v2834_v32 }
 0x21c   : > { %v3742_v55 = vpop.f32.mrf.mxu0  ;;  %v3764_v8 = vpop.f32.mrf.mxu1 }
 0x21e   : > { %v3743_v23 = vpop.f32.mrf.mxu0  ;;  %v3765_v29 = vpop.f32.mrf.mxu1 }
 0x21f   : > { %v3744_v59 = vadd.f32 %v3743_v23, %v3742_v55  ;;  %v3766_v3 = vadd.f32 %v3765_v29, %v3764_v8 }
 0x220   : > { %v3745_v11 = vpop.f32.mrf.mxu0  ;;  %v3767_v48 = vpop.f32.mrf.mxu1 }
 0x221   : > { %v2913_v61 = vadd.f32 %v3744_v59, %v2872_v37 }
 0x222   : > { %v3746_v12 = vpop.f32.mrf.mxu0  ;;  %v3768_v7 = vpop.f32.mrf.mxu1 }
 0x223   : > { %v3747_v62 = vadd.f32 %v3746_v12, %v3745_v11  ;;  %v2954_v13 = vadd.f32 %v3766_v3, %v2913_v61  ;;  %v3769_v28 = vadd.f32 %v3768_v7, %v3767_v48 }
 0x225   : > { %v2916_v19 = vadd.f32 %v3747_v62, %v2875_v2 }
 0x227   : > { %v2957_v38 = vadd.f32 %v3769_v28, %v2916_v19 }
 0x23c   : > { %v3786_v56 = vpop.f32.mrf.mxu0  ;;  %v3808_v22 = vpop.f32.mrf.mxu1 }
 0x23e   : > { %v3787_v57 = vpop.f32.mrf.mxu0  ;;  %v3809_v26 = vpop.f32.mrf.mxu1 }
 0x23f   : > { %v3788_v4 = vadd.f32 %v3787_v57, %v3786_v56  ;;  %v3810_v40 = vadd.f32 %v3809_v26, %v3808_v22 }
 0x240   : > { %v3789_v10 = vpop.f32.mrf.mxu0  ;;  %v3811_v58 = vpop.f32.mrf.mxu1 }
 0x241   : > { %v2995_v31 = vadd.f32 %v3788_v4, %v2954_v13 }
 0x242   : > { %v3790_v9 = vpop.f32.mrf.mxu0  ;;  %v3812_v42 = vpop.f32.mrf.mxu1 }
 0x243   : > { %v3791_v33 = vadd.f32 %v3790_v9, %v3789_v10  ;;  %v3036_v0 = vadd.f32 %v3810_v40, %v2995_v31  ;;  %v3813_v49 = vadd.f32 %v3812_v42, %v3811_v58 }
 0x245   : > { %v2998_v46 = vadd.f32 %v3791_v33, %v2957_v38 }
 0x247   : > { %v3039_v41 = vadd.f32 %v3813_v49, %v2998_v46 }
 0x25c   : > { %v3830_v30 = vpop.f32.mrf.mxu0  ;;  %v3852_v15 = vpop.f32.mrf.mxu1 }
 0x25e   : > { %v3831_v36 = vpop.f32.mrf.mxu0  ;;  %v3853_v14 = vpop.f32.mrf.mxu1 }
 0x25f   : > { %v3832_v43 = vadd.f32 %v3831_v36, %v3830_v30  ;;  %v3854_v52 = vadd.f32 %v3853_v14, %v3852_v15 }
 0x260   : > { %v3833_v17 = vpop.f32.mrf.mxu0  ;;  %v3855_v63 = vpop.f32.mrf.mxu1 }
 0x261   : > { %v3077_v50 = vadd.f32 %v3832_v43, %v3036_v0 }
 0x262   : > { %v3834_v1 = vpop.f32.mrf.mxu0  ;;  %v3856_v24 = vpop.f32.mrf.mxu1 }
 0x263   : > { %v3835_v27 = vadd.f32 %v3834_v1, %v3833_v17  ;;  %v3118_v45 = vadd.f32 %v3854_v52, %v3077_v50  ;;  %v3857_v55 = vadd.f32 %v3856_v24, %v3855_v63 }
 0x265   : > { %v3080_v54 = vadd.f32 %v3835_v27, %v3039_v41 }
 0x267   : > { %v3121_v11 = vadd.f32 %v3857_v55, %v3080_v54 }
 0x27c   : > { %v3874_v5 = vpop.f32.mrf.mxu0  ;;  %v3896_v35 = vpop.f32.mrf.mxu1 }
 0x27e   : > { %v3875_v6 = vpop.f32.mrf.mxu0  ;;  %v3897_v47 = vpop.f32.mrf.mxu1 }
 0x27f   : > { %v3876_v25 = vadd.f32 %v3875_v6, %v3874_v5  ;;  %v3898_v48 = vadd.f32 %v3897_v47, %v3896_v35 }
 0x280   : > { %v3877_v21 = vpop.f32.mrf.mxu0  ;;  %v3899_v16 = vpop.f32.mrf.mxu1 }
 0x281   : > { %v3159_v34 = vadd.f32 %v3876_v25, %v3118_v45 }
 0x282   : > { %v3878_v53 = vpop.f32.mrf.mxu0  ;;  %v3900_v23 = vpop.f32.mrf.mxu1 }
 0x283   : > { %v3879_v8 = vadd.f32 %v3878_v53, %v3877_v21  ;;  %v3200_v7 = vadd.f32 %v3898_v48, %v3159_v34  ;;  %v3901_v58 = vadd.f32 %v3900_v23, %v3899_v16 }
 0x285   : > { %v3162_v22 = vadd.f32 %v3879_v8, %v3121_v11 }
 0x287   : > { %v3203_v39 = vadd.f32 %v3901_v58, %v3162_v22 }
 0x29c   : > { %v3918_v29 = vpop.f32.mrf.mxu0  ;;  %v3940_v12 = vpop.f32.mrf.mxu1 }
 0x29e   : > { %v3919_v56 = vpop.f32.mrf.mxu0  ;;  %v3941_v26 = vpop.f32.mrf.mxu1 }
 0x29f   : > { %v3920_v57 = vadd.f32 %v3919_v56, %v3918_v29  ;;  %v3942_v30 = vadd.f32 %v3941_v26, %v3940_v12 }
 0x2a0   : > { %v3921_v10 = vpop.f32.mrf.mxu0  ;;  %v3943_v18 = vpop.f32.mrf.mxu1 }
 0x2a1   : > { %v3241_v9 = vadd.f32 %v3920_v57, %v3200_v7 }
 0x2a2   : > { %v3922_v42 = vpop.f32.mrf.mxu0  ;;  %v3944_v20 = vpop.f32.mrf.mxu1 }
 0x2a3   : > { %v3282_v15 = vadd.f32 %v3942_v30, %v3241_v9  ;;  %v3923_v36 = vadd.f32 %v3922_v42, %v3921_v10  ;;  %v3945_v51 = vadd.f32 %v3944_v20, %v3943_v18 }
 0x2a5   : > { %3288 = vst [vmem:[%s284_s15] sm:$0xff] %v3282_v15  ;;  %v3244_v44 = vadd.f32 %v3923_v36, %v3203_v39 }
 0x2a7   : > { %v3285_v59 = vadd.f32 %v3945_v51, %v3244_v44 }
 0x2a9   : > { %3289 = vst [vmem:[%s284_s15 + $0x8] sm:$0xff] %v3285_v59 }
 0x2aa   : > { %4342 = shalt.err (!%p4339_p9)
}
 0x2ab   : > { %s4343_s8 = scalar_lea.hbm %s4793_s11, 256  ;;  %s4347_s26 = scalar_lea.hbm %s4841_s5, 512 }
 0x2ac   : > { %p4344_p1 = scmp.ne.s32.totalorder %s4793_s11, %s4343_s8  ;;  %p4348_p11 = scmp.lt.s32.totalorder %s4793_s11, %s4841_s5 }
 0x2ad   : > { %p4349_p13 = scmp.lt.s32.totalorder %s4347_s26, %s4343_s8 }
 0x2ae   : > { %p4345_p8 = pnand %p4344_p1, %p4861_p6 }
 0x2af   : > { %p4350_p2 = por %p4349_p13, %p4348_p11 }
 0x2b0   : > { %p4346_p10 = pneg %p4345_p8 }
 0x2b2   : > { %p4351_p4 = pnand %p4350_p2, %p4346_p10 }
 0x2b4   : > { %4354 = shalt.err (!%p4351_p4)
}
 0x2b5   : > { %s4413_s28 = smov 128   ;;  %s4414_s30 = smov 8  }
 0x2b6   : > { %3960 = dma.vmem_to_hbm [thread:$0]  (%p4861_p6), %s4788_s17, 256, %s4793_s11, %s3291_s16, %s4413_s28, %s4413_s28, %s4414_s30  }
 0x2b7 PF: > { %s3319_s14 = sand.u32 1, %s4389_s18   ;;  %p4862_p12 = scmp.ne.s32.totalorder %s4848_s25, 0 }
 0x2b8   : > { %p4863_p0 = scmp.ge.s32.totalorder %s4401_s21, 2  ;;  %s3320_s9 = scalar_lea.sflag [#allocation4], %s3319_s14 }
 0x2ba   : > { %p3977_p5 = pnand %p4863_p0, %p4862_p12 }
 0x2bc   : > { %p3978_p3 = pneg %p3977_p5 }
 0x2be   : > { %4384 = dma.done.wait (%p3978_p3), %s3320_s9, 256  }
 0x2bf   : > { %4386 = vsyncadd (%p3978_p3), %s3320_s9, 4294967040  ;;  %p20_p7 = scmp.ge.s32.totalorder %s4528_s6, 4   ;;  %s4864_s18 = smov %s4393_s19 }
 0x2c0   : > { %s4865_s19 = smov %s4397_s20  ;;  %s4866_s20 = smov %s4538_s10 }
 0x2c1   : > { %s4867_s21 = smov %s4528_s6  ;;  %22 = sbr.rel (!%p20_p7) target bundleno = 7 (0x7), region = 97 }
 0x2c6   :  { %3325 = vsyncpa [#allocation3], 1 }
 0x2c7   :  { %3327 = vsyncpa [#allocation3 + $0x1], 1 }
 0x2c8   :  { %3328 = vsyncpa [#allocation6], 1 }
 0x2c9   :  { %3329 = vsyncpa [#allocation9], 1 }
 0x2ca   :  { %3330 = vsyncpa [#allocation4], 1 }
 0x2cb   :  { %3332 = vsyncpa [#allocation4 + $0x1], 1 }

</bundles_post_ra>
